<compile_context>
chip_gen: v5e
topology: v5e:2x2
jax: 0.10.0
libtpu: 0.0.40
codegen_flags: <defaults>
</compile_context>

<pallas_src>
import jax
import jax.numpy as jnp
from jax.experimental import pallas as pl
from jax.experimental.pallas import tpu as pltpu

H1_PAD = 512   # 400 padded to a lane multiple
H2_PAD = 384   # 300 padded to a lane multiple
LANE = 128


def _round_up(x, m):
    return ((x + m - 1) // m) * m


def _choose_tb(batch, tb_max):
    """Batch tile (lane dim): multiple of 128, divides B_pad tightly, and
    gives >= 2 grid steps when the batch is big enough (v7x megacore)."""
    tb_max = max(LANE, (tb_max // LANE) * LANE)
    b = _round_up(max(batch, 1), LANE)
    if b <= LANE:
        return b
    steps = max(2, pl.cdiv(b, tb_max))
    return min(tb_max, _round_up(pl.cdiv(b, steps), LANE))


def _discriminator_kernel(sT_ref, aT_ref, w1T_ref, b1T_ref, w2T_ref, b2T_ref,
                          w3T_ref, b3_ref, oT_ref):
    # Layer 1: sublane-aligned in-kernel "concat" (16 + 8 rows), then ONE MXU
    # dot with the fused (H1_PAD, sd+ad) weight. bf16 operands, f32 accum.
    xT = jnp.concatenate([sT_ref[...], aT_ref[...]], axis=0).astype(jnp.bfloat16)
    h1T = jnp.dot(w1T_ref[...], xT, preferred_element_type=jnp.float32)
    h1T = jnp.tanh(h1T + b1T_ref[...])                       # (H1_PAD, TB) f32

    # Layer 2 (MXU).  f32 activations kept (v5e-safe EUP/VPU path).
    h2T = jnp.dot(w2T_ref[...], h1T.astype(jnp.bfloat16),
                  preferred_element_type=jnp.float32)
    h2T = jnp.tanh(h2T + b2T_ref[...])                       # (H2_PAD, TB) f32

    # Layer 3 OFF the MXU: VPU multiply (lane-broadcast w3 column) + sublane
    # reduce -> lane-dense (1, TB) row.  Padded hidden rows are exactly zero.
    zT = jnp.sum(h2T * w3T_ref[...], axis=0, keepdims=True) + b3_ref[...]
    oT_ref[...] = jax.nn.sigmoid(zT).astype(oT_ref.dtype)    # lane-dense store


def discriminator_forward(state, action, prepared_params, *, tb=1024):
    """state: (B, state_dim), action: (B, action_dim) -> (B, 1)."""
    w1T, b1T, w2T, b2T, w3T, b3 = prepared_params
    B, sd = state.shape
    ad = action.shape[1]

    TB = _choose_tb(B, tb)
    B_pad = _round_up(B, TB)

    # Batch lives on the lane dimension inside the kernel: transpose the tiny
    # (B, sd)/(B, ad) inputs once on the XLA side (padding rows are zero and
    # sliced off at the end).
    sT = jnp.pad(state.astype(jnp.float32), ((0, B_pad - B), (0, 0))).T
    aT = jnp.pad(action.astype(jnp.float32), ((0, B_pad - B), (0, 0))).T

    grid = (B_pad // TB,)

    def resident(shape):
        # Constant block index across the batch grid -> stays resident in VMEM.
        return pl.BlockSpec(shape, lambda i: (0, 0))

    outT = pl.pallas_call(
        _discriminator_kernel,
        out_shape=jax.ShapeDtypeStruct((1, B_pad), jnp.float32),
        grid=grid,
        in_specs=[
            pl.BlockSpec((sd, TB), lambda i: (0, i)),        # state^T tile
            pl.BlockSpec((ad, TB), lambda i: (0, i)),        # action^T tile
            resident((H1_PAD, sd + ad)),                     # W1^T (bf16)
            resident((H1_PAD, 1)),                           # b1^T (f32)
            resident((H2_PAD, H1_PAD)),                      # W2^T (bf16)
            resident((H2_PAD, 1)),                           # b2^T (f32)
            resident((H2_PAD, 1)),                           # w3 column (f32)
            resident((1, 1)),                                # b3 (f32)
        ],
        out_specs=pl.BlockSpec((1, TB), lambda i: (0, i)),   # lane-dense row
        compiler_params=pltpu.CompilerParams(
            dimension_semantics=("parallel",),               # megacore on v7x
            vmem_limit_bytes=32 * 1024 * 1024,               # safe on 64 MiB v7x
        ),
    )(sT, aT, w1T, b1T, w2T, b2T, w3T, b3)
    return outT[0, :B].reshape(B, 1)


def init_params(key, state_dim, action_dim):
    """Deterministic synthetic parameters (PyTorch-Linear-like uniform init),
    stored as (in, out) so the reference math is x @ W + b."""
    d_in = state_dim + action_dim
    ks = jax.random.split(key, 6)

    def lin(kw, kb, fan_in, fan_out):
        bound = 1.0 / jnp.sqrt(jnp.float32(fan_in))
        w = jax.random.uniform(kw, (fan_in, fan_out), jnp.float32, -bound, bound)
        b = jax.random.uniform(kb, (1, fan_out), jnp.float32, -bound, bound)
        return w, b

    w1, b1 = lin(ks[0], ks[1], d_in, 400)
    w2, b2 = lin(ks[2], ks[3], 400, 300)
    w3, b3 = lin(ks[4], ks[5], 300, 1)
    return (w1, b1, w2, b2, w3, b3)


def prepare_params(params):
    """Offline prep: zero-pad hidden dims to lane multiples (400->512,
    300->384), transpose weights/biases to the column-major ("network
    transposed") layout, and cast matmul weights to bf16.  Padded hidden
    rows/cols AND bias entries are zero, so padded units evaluate to
    tanh(0)=0 and contribute nothing downstream."""
    w1, b1, w2, b2, w3, b3 = params
    h1 = w1.shape[1]
    h2 = w2.shape[1]
    w1p = jnp.pad(w1, ((0, 0), (0, H1_PAD - h1)))
    b1p = jnp.pad(b1, ((0, 0), (0, H1_PAD - h1)))
    w2p = jnp.pad(w2, ((0, H1_PAD - h1), (0, H2_PAD - h2)))
    b2p = jnp.pad(b2, ((0, 0), (0, H2_PAD - h2)))
    w3p = jnp.pad(w3, ((0, H2_PAD - h2), (0, 0)))
    return (w1p.T.astype(jnp.bfloat16),      # (H1_PAD, sd+ad) bf16
            b1p.T.astype(jnp.float32),       # (H1_PAD, 1)     f32
            w2p.T.astype(jnp.bfloat16),      # (H2_PAD, H1_PAD) bf16
            b2p.T.astype(jnp.float32),       # (H2_PAD, 1)     f32
            w3p.astype(jnp.float32),         # (H2_PAD, 1)     f32 (VPU path)
            b3.astype(jnp.float32))          # (1, 1)          f32


def reference_forward(state, action, params):
    w1, b1, w2, b2, w3, b3 = params
    x = jnp.concatenate([state, action], axis=1)
    x = jnp.tanh(x @ w1 + b1)
    x = jnp.tanh(x @ w2 + b2)
    return jax.nn.sigmoid(x @ w3 + b3)


if __name__ == "__main__":
    key = jax.random.PRNGKey(0)
    k_state, k_action, k_params = jax.random.split(key, 3)

    batch, state_dim, action_dim = 8, 16, 8
    state = jax.random.normal(k_state, (batch, state_dim), jnp.float32)
    action = jax.random.normal(k_action, (batch, action_dim), jnp.float32)
    params = init_params(k_params, state_dim, action_dim)
    prepared = prepare_params(params)

    out = discriminator_forward(state, action, prepared)
    out = jax.block_until_ready(out)

    ref = reference_forward(state, action, params)
    assert out.shape == (batch, 1)
    # bf16 MXU operands vs f32 reference -> loosened tolerance.
    assert jnp.allclose(out, ref, atol=2e-2, rtol=2e-2), "mismatch vs reference"
    print("KERNEL_OK")
</pallas_src>

<mosaic_0001>
module attributes {stable_mosaic.version = 11 : i64} {
  func.func @_discriminator_kernel(%arg0: i32, %arg1: memref<16x128xf32, #tpu.memory_space<vmem>>, %arg2: memref<8x128xf32, #tpu.memory_space<vmem>>, %arg3: memref<512x24xbf16, #tpu.memory_space<vmem>>, %arg4: memref<512x1xf32, #tpu.memory_space<vmem>>, %arg5: memref<384x512xbf16, #tpu.memory_space<vmem>>, %arg6: memref<384x1xf32, #tpu.memory_space<vmem>>, %arg7: memref<384x1xf32, #tpu.memory_space<vmem>>, %arg8: memref<1x1xf32, #tpu.memory_space<vmem>>, %arg9: memref<1x128xf32, #tpu.memory_space<vmem>>) attributes {dimension_semantics = [#tpu.dimension_semantics<parallel>], iteration_bounds = array<i64: 1>, scalar_prefetch = 0 : i64, scratch_operands = 0 : i64, tpu.core_type = #tpu.core_type<tc>, window_params = [{transform_indices = @transform_0, window_bounds = array<i64: 16, 128>}, {transform_indices = @transform_1, window_bounds = array<i64: 8, 128>}, {pipeline_mode = #tpu.pipeline_mode<synchronous>, transform_indices = @transform_2, window_bounds = array<i64: 512, 24>}, {pipeline_mode = #tpu.pipeline_mode<synchronous>, transform_indices = @transform_3, window_bounds = array<i64: 512, 1>}, {pipeline_mode = #tpu.pipeline_mode<synchronous>, transform_indices = @transform_4, window_bounds = array<i64: 384, 512>}, {pipeline_mode = #tpu.pipeline_mode<synchronous>, transform_indices = @transform_5, window_bounds = array<i64: 384, 1>}, {pipeline_mode = #tpu.pipeline_mode<synchronous>, transform_indices = @transform_6, window_bounds = array<i64: 384, 1>}, {pipeline_mode = #tpu.pipeline_mode<synchronous>, transform_indices = @transform_7, window_bounds = array<i64: 1, 1>}, {transform_indices = @transform_8, window_bounds = array<i64: 1, 128>}]} {
    %c0 = arith.constant 0 : index
    %c0_0 = arith.constant 0 : index
    %0 = vector.load %arg1[%c0, %c0_0] : memref<16x128xf32, #tpu.memory_space<vmem>>, vector<16x128xf32>
    %c0_1 = arith.constant 0 : index
    %c0_2 = arith.constant 0 : index
    %1 = vector.load %arg2[%c0_1, %c0_2] : memref<8x128xf32, #tpu.memory_space<vmem>>, vector<8x128xf32>
    %2 = tpu.concatenate %0, %1 in 0 : vector<16x128xf32>, vector<8x128xf32> -> vector<24x128xf32>
    %3 = arith.truncf %2 : vector<24x128xf32> to vector<24x128xbf16>
    %c0_3 = arith.constant 0 : index
    %c0_4 = arith.constant 0 : index
    %4 = vector.load %arg3[%c0_3, %c0_4] : memref<512x24xbf16, #tpu.memory_space<vmem>>, vector<512x24xbf16>
    %cst = arith.constant dense<0.000000e+00> : vector<512x128xf32>
    %5 = tpu.matmul %4, %3, %cst {dimension_numbers = #tpu.dot_dimension_numbers<[1], [0], [0], [1], [0, 0, 1, 1], [], []>} : vector<512x24xbf16>, vector<24x128xbf16>, vector<512x128xf32> -> vector<512x128xf32>
    %c0_5 = arith.constant 0 : index
    %c0_6 = arith.constant 0 : index
    %6 = vector.load %arg4[%c0_5, %c0_6] : memref<512x1xf32, #tpu.memory_space<vmem>>, vector<512x1xf32>
    %7 = vector.broadcast %6 : vector<512x1xf32> to vector<512x128xf32>
    %8 = arith.addf %5, %7 : vector<512x128xf32>
    %9 = math.tanh %8 : vector<512x128xf32>
    %c0_7 = arith.constant 0 : index
    %c0_8 = arith.constant 0 : index
    %10 = vector.load %arg5[%c0_7, %c0_8] : memref<384x512xbf16, #tpu.memory_space<vmem>>, vector<384x512xbf16>
    %11 = arith.truncf %9 : vector<512x128xf32> to vector<512x128xbf16>
    %cst_9 = arith.constant dense<0.000000e+00> : vector<384x128xf32>
    %12 = tpu.matmul %10, %11, %cst_9 {dimension_numbers = #tpu.dot_dimension_numbers<[1], [0], [0], [1], [0, 0, 1, 1], [], []>} : vector<384x512xbf16>, vector<512x128xbf16>, vector<384x128xf32> -> vector<384x128xf32>
    %c0_10 = arith.constant 0 : index
    %c0_11 = arith.constant 0 : index
    %13 = vector.load %arg6[%c0_10, %c0_11] : memref<384x1xf32, #tpu.memory_space<vmem>>, vector<384x1xf32>
    %14 = vector.broadcast %13 : vector<384x1xf32> to vector<384x128xf32>
    %15 = arith.addf %12, %14 : vector<384x128xf32>
    %16 = math.tanh %15 : vector<384x128xf32>
    %c0_12 = arith.constant 0 : index
    %c0_13 = arith.constant 0 : index
    %17 = vector.load %arg7[%c0_12, %c0_13] : memref<384x1xf32, #tpu.memory_space<vmem>>, vector<384x1xf32>
    %18 = vector.broadcast %17 : vector<384x1xf32> to vector<384x128xf32>
    %19 = arith.mulf %16, %18 : vector<384x128xf32>
    %cst_14 = arith.constant dense<0.000000e+00> : vector<128xf32>
    %20 = vector.multi_reduction <add>, %19, %cst_14 [0] : vector<384x128xf32> to vector<128xf32>
    %21 = vector.shape_cast %20 : vector<128xf32> to vector<1x128xf32>
    %c0_15 = arith.constant 0 : index
    %c0_16 = arith.constant 0 : index
    %22 = vector.load %arg8[%c0_15, %c0_16] : memref<1x1xf32, #tpu.memory_space<vmem>>, vector<1x1xf32>
    %23 = vector.broadcast %22 : vector<1x1xf32> to vector<1x128xf32>
    %24 = arith.addf %21, %23 : vector<1x128xf32>
    %25 = arith.negf %24 : vector<1x128xf32>
    %26 = math.exp %25 : vector<1x128xf32>
    %cst_17 = arith.constant 1.000000e+00 : f32
    %27 = vector.broadcast %cst_17 : f32 to vector<1x128xf32>
    %28 = arith.addf %27, %26 : vector<1x128xf32>
    %29 = arith.divf %27, %28 : vector<1x128xf32>
    %c0_18 = arith.constant 0 : index
    %c0_19 = arith.constant 0 : index
    %30 = vector.load %arg9[%c0_18, %c0_19] : memref<1x128xf32, #tpu.memory_space<vmem>>, vector<1x128xf32>
    tpu.vector_store %arg9[%c0_18, %c0_19], %29 {strides = array<i32>} : memref<1x128xf32, #tpu.memory_space<vmem>>, vector<1x128xf32>,
    return
  }
  func.func @transform_0(%arg0: i32) -> (i32, i32) {
    %c0_i32 = arith.constant 0 : i32
    %c0_i32_0 = arith.constant 0 : i32
    return %c0_i32, %arg0 : i32, i32
  }
  func.func @transform_1(%arg0: i32) -> (i32, i32) {
    %c0_i32 = arith.constant 0 : i32
    %c0_i32_0 = arith.constant 0 : i32
    return %c0_i32, %arg0 : i32, i32
  }
  func.func @transform_2(%arg0: i32) -> (i32, i32) {
    %c0_i32 = arith.constant 0 : i32
    %c0_i32_0 = arith.constant 0 : i32
    %c0_i32_1 = arith.constant 0 : i32
    return %c0_i32, %c0_i32_0 : i32, i32
  }
  func.func @transform_3(%arg0: i32) -> (i32, i32) {
    %c0_i32 = arith.constant 0 : i32
    %c0_i32_0 = arith.constant 0 : i32
    %c0_i32_1 = arith.constant 0 : i32
    return %c0_i32, %c0_i32_0 : i32, i32
  }
  func.func @transform_4(%arg0: i32) -> (i32, i32) {
    %c0_i32 = arith.constant 0 : i32
    %c0_i32_0 = arith.constant 0 : i32
    %c0_i32_1 = arith.constant 0 : i32
    return %c0_i32, %c0_i32_0 : i32, i32
  }
  func.func @transform_5(%arg0: i32) -> (i32, i32) {
    %c0_i32 = arith.constant 0 : i32
    %c0_i32_0 = arith.constant 0 : i32
    %c0_i32_1 = arith.constant 0 : i32
    return %c0_i32, %c0_i32_0 : i32, i32
  }
  func.func @transform_6(%arg0: i32) -> (i32, i32) {
    %c0_i32 = arith.constant 0 : i32
    %c0_i32_0 = arith.constant 0 : i32
    %c0_i32_1 = arith.constant 0 : i32
    return %c0_i32, %c0_i32_0 : i32, i32
  }
  func.func @transform_7(%arg0: i32) -> (i32, i32) {
    %c0_i32 = arith.constant 0 : i32
    %c0_i32_0 = arith.constant 0 : i32
    %c0_i32_1 = arith.constant 0 : i32
    return %c0_i32, %c0_i32_0 : i32, i32
  }
  func.func @transform_8(%arg0: i32) -> (i32, i32) {
    %c0_i32 = arith.constant 0 : i32
    %c0_i32_0 = arith.constant 0 : i32
    return %c0_i32, %arg0 : i32, i32
  }
}

</mosaic_0001>

<bundles_post_ra>
// kernel: tpu_custom_call.1
= control target key start
LH: loop header
LB: loop body
LE: loop exit
PB: predicated region body
PF: predicated region fallthrough
CT: control target
= control target key end

     0   :  { %s5744_s0 = inlined_call_operand.vmem [shape: f32[16,128], index: 0, kind: input, shape index: {}]   ;;  %s5745_s1 = inlined_call_operand.vmem [shape: f32[8,128], index: 1, kind: input, shape index: {}]   ;;  %s5746_s2 = inlined_call_operand.vmem [shape: bf16[512,24], index: 2, kind: input, shape index: {}]   ;;  %s5747_s3 = inlined_call_operand.vmem [shape: f32[512,1], index: 3, kind: input, shape index: {}]   ;;  %s5748_s4 = inlined_call_operand.vmem [shape: bf16[384,512], index: 4, kind: input, shape index: {}]   ;;  %s5749_s5 = inlined_call_operand.vmem [shape: f32[384,1], index: 5, kind: input, shape index: {}]   ;;  %s5750_s6 = inlined_call_operand.vmem [shape: f32[384,1], index: 6, kind: input, shape index: {}]   ;;  %s5751_s7 = inlined_call_operand.<no memory space> [shape: f32[1,1], index: 7, kind: input, shape index: {}]   ;;  %s5752_s8 = inlined_call_operand.hbm [shape: f32[1,128], index: 8, kind: output, shape index: {}]  }
   0x1   :  { %v13_v0 = vstv %s5751_s7 }
   0x2   :  { %14 = vst [vmem:[#allocation2] sm:$0x1] %v13_v0 }
   0x3   :  { %v106_v1 = vld [vmem:[%s5747_s3 + $0x20] sm:$0xff]  ;;  %v104_v2 = vld [vmem:[%s5747_s3 + $0x10] sm:$0xff]  ;;  %v3821_v4 = vmov 0   ;;  %vm743_vm0 = vcmask 1043456   ;;  %v34_v8 = vld [vmem:[%s5744_s0 + $0x8] sm:$0xff] }
   0x4   :  { %v102_v3 = vld [vmem:[%s5747_s3] sm:$0xff]  ;;  %3566 = vset.pattern.permute.xlu2 %v3821_v4  ;;  %3565 = vset.pattern.permute.xlu1 %v3821_v4  ;;  %v107_v11 = vld [vmem:[%s5747_s3 + $0x28] sm:$0xff] }
   0x5   :  { %v35_v5 = vld [vmem:[%s5745_s1] sm:$0xff]  ;;  %3564 = vset.pattern.permute.xlu0 %v3821_v4  ;;  %188 = vperm.xlu2 %3566, %v106_v1  }
   0x6   :  { %v37_v6 = vpack.c.bf16 %v35_v5, %v35_v5  ;;  %v33_v7 = vld [vmem:[%s5744_s0] sm:$0xff]  ;;  %178 = vperm.xlu1 %3565, %v104_v2   ;;  %168 = vperm.xlu0 %3564, %v102_v3  }
   0x7   :  { %v36_v10 = vpack.c.bf16 %v34_v8, %v33_v7 }
   0x8   :  { %v745_v9 = vsel %vm743_vm0, %v37_v6, 0 }
   0x9   :  { %753 = vmatpush.bf16.msra.mxu0 %v745_v9 }
   0xa   :  { %15 = vsyncpa [#allocation4], 0  ;;  %v105_v12 = vld [vmem:[%s5747_s3 + $0x18] sm:$0xff]  ;;  %v103_v13 = vld [vmem:[%s5747_s3 + $0x8] sm:$0xff]  ;;  %vm646_vm1 = vcmask 195584   ;;  %s2864_s20 = sshll.u32 %s5752_s8, 4  ;;  %s2865_s20 = int_to_ptr.hbm [resolvable:$true] %s2864_s20 }
   0xb   :  { %v3418_v14 = vld [vmem:[%s5746_s2] sm:$0xff]  ;;  %v109_v16 = vld [vmem:[%s5747_s3 + $0x38] sm:$0xff]  ;;  %v108_v17 = vld [vmem:[%s5747_s3 + $0x30] sm:$0xff] }
   0xc   :  { %v110_v15 = vld [vmem:[%s5747_s3 + $0x40] sm:$0xff]  ;;  %v113_v18 = vld [vmem:[%s5747_s3 + $0x58] sm:$0xff]  ;;  %v112_v19 = vld [vmem:[%s5747_s3 + $0x50] sm:$0xff] }
   0xd   :  { %754 = vmatpush.bf16.msra.mxu0 %v36_v10  ;;  %193 = vperm.xlu2 %3566, %v107_v11   ;;  %v111_v20 = vld [vmem:[%s5747_s3 + $0x48] sm:$0xff]  ;;  %v116_v22 = vld [vmem:[%s5747_s3 + $0x70] sm:$0xff]  ;;  %v114_v24 = vld [vmem:[%s5747_s3 + $0x60] sm:$0xff] }
   0xe   :  { %183 = vperm.xlu1 %3565, %v105_v12   ;;  %173 = vperm.xlu0 %3564, %v103_v13   ;;  %v3419_v21 = vld [vmem:[%s5746_s2 + $0x8] sm:$0xff]  ;;  %v118_v26 = vld [vmem:[%s5747_s3 + $0x80] sm:$0xff]  ;;  %v117_v27 = vld [vmem:[%s5747_s3 + $0x78] sm:$0xff] }
   0xf   :  { %v115_v23 = vld [vmem:[%s5747_s3 + $0x68] sm:$0xff]  ;;  %v3420_v28 = vld [vmem:[%s5746_s2 + $0x10] sm:$0xff]  ;;  %v122_v29 = vld [vmem:[%s5747_s3 + $0xa0] sm:$0xff] }
  0x10   :  { %3001 = vmatmul.msk.bf16.vlgmr.msra.gmra.mxu0 %vm646_vm1, %v3418_v14  ;;  %v119_v25 = vld [vmem:[%s5747_s3 + $0x88] sm:$0xff]  ;;  %v121_v30 = vld [vmem:[%s5747_s3 + $0x98] sm:$0xff]  ;;  %v120_v31 = vld [vmem:[%s5747_s3 + $0x90] sm:$0xff] }
  0x11   :  { %v125_v32 = vld [vmem:[%s5747_s3 + $0xb8] sm:$0xff]  ;;  %v124_v33 = vld [vmem:[%s5747_s3 + $0xb0] sm:$0xff]  ;;  %v123_v34 = vld [vmem:[%s5747_s3 + $0xa8] sm:$0xff] }
  0x12   :  { %v3421_v35 = vld [vmem:[%s5746_s2 + $0x18] sm:$0xff]  ;;  %v128_v36 = vld [vmem:[%s5747_s3 + $0xd0] sm:$0xff]  ;;  %v127_v37 = vld [vmem:[%s5747_s3 + $0xc8] sm:$0xff] }
  0x13   :  { %v126_v38 = vld [vmem:[%s5747_s3 + $0xc0] sm:$0xff]  ;;  %v131_v39 = vld [vmem:[%s5747_s3 + $0xe8] sm:$0xff]  ;;  %v129_v41 = vld [vmem:[%s5747_s3 + $0xd8] sm:$0xff] }
  0x14   :  { %v130_v40 = vld [vmem:[%s5747_s3 + $0xe0] sm:$0xff]  ;;  %v133_v44 = vld [vmem:[%s5747_s3 + $0xf8] sm:$0xff]  ;;  %v132_v45 = vld [vmem:[%s5747_s3 + $0xf0] sm:$0xff] }
  0x15   :  { %208 = vperm.xlu2 %3566, %v110_v15   ;;  %v3422_v42 = vld [vmem:[%s5746_s2 + $0x20] sm:$0xff]  ;;  %v137_v46 = vld [vmem:[%s5747_s3 + $0x118] sm:$0xff]  ;;  %v136_v47 = vld [vmem:[%s5747_s3 + $0x110] sm:$0xff] }
  0x16   :  { %203 = vperm.xlu1 %3565, %v109_v16   ;;  %198 = vperm.xlu0 %3564, %v108_v17   ;;  %v134_v43 = vld [vmem:[%s5747_s3 + $0x100] sm:$0xff]  ;;  %v135_v48 = vld [vmem:[%s5747_s3 + $0x108] sm:$0xff]  ;;  %v140_v50 = vld [vmem:[%s5747_s3 + $0x130] sm:$0xff] }
  0x17   :  { %v3423_v49 = vld [vmem:[%s5746_s2 + $0x28] sm:$0xff]  ;;  %v138_v52 = vld [vmem:[%s5747_s3 + $0x120] sm:$0xff]  ;;  %v141_v55 = vld [vmem:[%s5747_s3 + $0x138] sm:$0xff] }
  0x18   :  { %v139_v51 = vld [vmem:[%s5747_s3 + $0x128] sm:$0xff]  ;;  %v142_v54 = vld [vmem:[%s5747_s3 + $0x140] sm:$0xff]  ;;  %v3424_v56 = vld [vmem:[%s5746_s2 + $0x30] sm:$0xff] }
  0x19   :  { %v143_v53 = vld [vmem:[%s5747_s3 + $0x148] sm:$0xff]  ;;  %v146_v57 = vld [vmem:[%s5747_s3 + $0x160] sm:$0xff]  ;;  %v145_v58 = vld [vmem:[%s5747_s3 + $0x158] sm:$0xff] }
  0x1a   :  { %v144_v59 = vld [vmem:[%s5747_s3 + $0x150] sm:$0xff]  ;;  %v149_v61 = vld [vmem:[%s5747_s3 + $0x178] sm:$0xff]  ;;  %v147_v63 = vld [vmem:[%s5747_s3 + $0x168] sm:$0xff] }
  0x1b   :  { %v148_v62 = vld [vmem:[%s5747_s3 + $0x170] sm:$0xff]  ;;  %v3425_v0 = vld [vmem:[%s5746_s2 + $0x38] sm:$0xff]  ;;  %v151_v3 = vld [vmem:[%s5747_s3 + $0x188] sm:$0xff] }
  0x1c   :  { %v152_v2 = vld [vmem:[%s5747_s3 + $0x190] sm:$0xff]  ;;  %v150_v4 = vld [vmem:[%s5747_s3 + $0x180] sm:$0xff]  ;;  %v155_v6 = vld [vmem:[%s5747_s3 + $0x1a8] sm:$0xff] }
  0x1d   :  { %223 = vperm.xlu2 %3566, %v113_v18   ;;  %v154_v7 = vld [vmem:[%s5747_s3 + $0x1a0] sm:$0xff]  ;;  %v153_v8 = vld [vmem:[%s5747_s3 + $0x198] sm:$0xff]  ;;  %v164_v14 = vld [vmem:[%s5747_s3 + $0x1f0] sm:$0xff] }
  0x1e   :  { %218 = vperm.xlu1 %3565, %v112_v19   ;;  %213 = vperm.xlu0 %3564, %v111_v20   ;;  %v3426_v9 = vld [vmem:[%s5746_s2 + $0x40] sm:$0xff]  ;;  %v165_v13 = vld [vmem:[%s5747_s3 + $0x1f8] sm:$0xff]  ;;  %v156_v15 = vld [vmem:[%s5747_s3 + $0x1b0] sm:$0xff] }
  0x1f   :  { %v160_v20 = vld [vmem:[%s5747_s3 + $0x1d0] sm:$0xff] }
  0x20   :  { %3002 = vmatmul.msk.bf16.gmra.mxu0 %vm646_vm1, %v3419_v21  ;;  %v163_v21 = vld [vmem:[%s5747_s3 + $0x1e8] sm:$0xff] }
  0x25   :  { %238 = vperm.xlu2 %3566, %v116_v22   ;;  %v162_v22 = vld [vmem:[%s5747_s3 + $0x1e0] sm:$0xff] }
  0x26   :  { %233 = vperm.xlu1 %3565, %v115_v23   ;;  %228 = vperm.xlu0 %3564, %v114_v24   ;;  %v3427_v23 = vld [vmem:[%s5746_s2 + $0x48] sm:$0xff] }
  0x2d   :  { %253 = vperm.xlu2 %3566, %v119_v25  }
  0x2e   :  { %248 = vperm.xlu1 %3565, %v118_v26   ;;  %243 = vperm.xlu0 %3564, %v117_v27  }
  0x30   :  { %3003 = vmatmul.msk.bf16.gmra.mxu0 %vm646_vm1, %v3420_v28 }
  0x35   :  { %268 = vperm.xlu2 %3566, %v122_v29   ;;  %v159_v29 = vld [vmem:[%s5747_s3 + $0x1c8] sm:$0xff] }
  0x36   :  { %263 = vperm.xlu1 %3565, %v121_v30   ;;  %258 = vperm.xlu0 %3564, %v120_v31   ;;  %v158_v31 = vld [vmem:[%s5747_s3 + $0x1c0] sm:$0xff] }
  0x3d   :  { %283 = vperm.xlu2 %3566, %v125_v32   ;;  %v161_v32 = vld [vmem:[%s5747_s3 + $0x1d8] sm:$0xff] }
  0x3e   :  { %278 = vperm.xlu1 %3565, %v124_v33   ;;  %273 = vperm.xlu0 %3564, %v123_v34  }
  0x40   :  { %3004 = vmatmul.msk.bf16.gmra.mxu0 %vm646_vm1, %v3421_v35 }
  0x45   :  { %298 = vperm.xlu2 %3566, %v128_v36  }
  0x46   :  { %293 = vperm.xlu1 %3565, %v127_v37   ;;  %288 = vperm.xlu0 %3564, %v126_v38   ;;  %v1109_v37 = vld [vmem:[%s5749_s5 + $0x8] sm:$0xff]  ;;  %v1108_v38 = vld [vmem:[%s5749_s5] sm:$0xff] }
  0x4d   :  { %313 = vperm.xlu2 %3566, %v131_v39   ;;  %v157_v39 = vld [vmem:[%s5747_s3 + $0x1b8] sm:$0xff] }
  0x4e   :  { %308 = vperm.xlu1 %3565, %v130_v40   ;;  %303 = vperm.xlu0 %3564, %v129_v41   ;;  %v3428_v40 = vld [vmem:[%s5746_s2 + $0x50] sm:$0xff] }
  0x50   :  { %3005 = vmatmul.msk.bf16.gmra.mxu0 %vm646_vm1, %v3422_v42 }
  0x55   :  { %328 = vperm.xlu2 %3566, %v134_v43  }
  0x56   :  { %323 = vperm.xlu1 %3565, %v133_v44   ;;  %318 = vperm.xlu0 %3564, %v132_v45  }
  0x5d   :  { %343 = vperm.xlu2 %3566, %v137_v46  }
  0x5e   :  { %338 = vperm.xlu1 %3565, %v136_v47   ;;  %333 = vperm.xlu0 %3564, %v135_v48   ;;  %v1112_v47 = vld [vmem:[%s5749_s5 + $0x20] sm:$0xff]  ;;  %v1111_v48 = vld [vmem:[%s5749_s5 + $0x18] sm:$0xff] }
  0x5f   :  { %v189_v36 = vpop.permute.xlu2 %188 }
  0x60   :  { %3006 = vmatmul.msk.bf16.gmra.mxu0 %vm646_vm1, %v3423_v49  ;;  %v1110_v49 = vld [vmem:[%s5749_s5 + $0x10] sm:$0xff] }
  0x65   :  { %358 = vperm.xlu2 %3566, %v140_v50  }
  0x66   :  { %353 = vperm.xlu1 %3565, %v139_v51   ;;  %348 = vperm.xlu0 %3564, %v138_v52  }
  0x67   :  { %v194_v50 = vpop.permute.xlu2 %193 }
  0x6d   :  { %373 = vperm.xlu2 %3566, %v143_v53  }
  0x6e   :  { %368 = vperm.xlu1 %3565, %v142_v54   ;;  %363 = vperm.xlu0 %3564, %v141_v55   ;;  %v1115_v54 = vld [vmem:[%s5749_s5 + $0x38] sm:$0xff]  ;;  %v1114_v55 = vld [vmem:[%s5749_s5 + $0x30] sm:$0xff] }
  0x70   :  { %3007 = vmatmul.msk.bf16.gmra.mxu0 %vm646_vm1, %v3424_v56  ;;  %v1113_v56 = vld [vmem:[%s5749_s5 + $0x28] sm:$0xff] }
  0x75   :  { %388 = vperm.xlu2 %3566, %v146_v57   ;;  %v3429_v57 = vld [vmem:[%s5746_s2 + $0x58] sm:$0xff] }
  0x76   :  { %383 = vperm.xlu1 %3565, %v145_v58   ;;  %378 = vperm.xlu0 %3564, %v144_v59  }
  0x78   :  { %v169_v60 = vpop.permute.xlu0 %168  ;;  %v179_v18 = vpop.permute.xlu1 %178 }
  0x7d   :  { %403 = vperm.xlu2 %3566, %v149_v61  }
  0x7e   :  { %398 = vperm.xlu1 %3565, %v148_v62   ;;  %393 = vperm.xlu0 %3564, %v147_v63  }
  0x80   :  { %3008 = vmatmul.msk.bf16.gmra.mxu0 %vm646_vm1, %v3425_v0  ;;  %v174_v1 = vpop.permute.xlu0 %173  ;;  %v184_v30 = vpop.permute.xlu1 %183  ;;  %v1118_v0 = vld [vmem:[%s5749_s5 + $0x50] sm:$0xff] }
  0x85   :  { %418 = vperm.xlu2 %3566, %v152_v2   ;;  %v1116_v2 = vld [vmem:[%s5749_s5 + $0x40] sm:$0xff] }
  0x86   :  { %413 = vperm.xlu1 %3565, %v151_v3   ;;  %408 = vperm.xlu0 %3564, %v150_v4  }
  0x88   :  { %v4065_v5 = vpop.permute.xlu0 %198  ;;  %v204_v3 = vpop.permute.xlu1 %203 }
  0x8d   :  { %v756_v10 = vpop.f32.mrf.mxu0  ;;  %433 = vperm.xlu2 %3566, %v155_v6  }
  0x8e   :  { %428 = vperm.xlu1 %3565, %v154_v7   ;;  %423 = vperm.xlu0 %3564, %v153_v8   ;;  %v757_v12 = vadd.f32 %v756_v10, %v169_v60  ;;  %v1120_v7 = vld [vmem:[%s5749_s5 + $0x60] sm:$0xff]  ;;  %v1119_v8 = vld [vmem:[%s5749_s5 + $0x58] sm:$0xff] }
  0x90   :  { %3009 = vmatmul.msk.bf16.gmra.mxu0 %vm646_vm1, %v3426_v9  ;;  %v4080_v11 = vpop.permute.xlu0 %213  ;;  %3567 = vtanh.f32 %v757_v12  ;;  %v3430_v9 = vld [vmem:[%s5746_s2 + $0x60] sm:$0xff] }
  0x95   :  { %v758_v16 = vpop.f32.mrf.mxu0  ;;  %483 = vperm.xlu2 %3566, %v165_v13  }
  0x96   :  { %v759_v17 = vadd.f32 %v758_v16, %v174_v1  ;;  %478 = vperm.xlu1 %3565, %v164_v14   ;;  %438 = vperm.xlu0 %3564, %v156_v15   ;;  %v3568_v24 = vpop.eup %3567  ;;  %v1117_v1 = vld [vmem:[%s5749_s5 + $0x48] sm:$0xff]  ;;  %v1124_v16 = vld [vmem:[%s5749_s5 + $0x80] sm:$0xff] }
  0x98   :  { %3569 = vtanh.f32 %v759_v17  ;;  %v4091_v19 = vpop.permute.xlu0 %228  ;;  %v1123_v17 = vld [vmem:[%s5749_s5 + $0x78] sm:$0xff] }
  0x9d   :  { %v761_v25 = vpop.f32.mrf.mxu0  ;;  %458 = vperm.xlu2 %3566, %v160_v20  }
  0x9e   :  { %v3570_v26 = vpop.eup %3569  ;;  %473 = vperm.xlu1 %3565, %v163_v21   ;;  %468 = vperm.xlu0 %3564, %v162_v22   ;;  %v762_v28 = vadd.f32 %v761_v25, %v179_v18  ;;  %v1122_v18 = vld [vmem:[%s5749_s5 + $0x70] sm:$0xff]  ;;  %v1127_v22 = vld [vmem:[%s5749_s5 + $0x98] sm:$0xff]  ;;  %v3431_v25 = vld [vmem:[%s5746_s2 + $0x68] sm:$0xff] }
  0x9f   :  { %v4105_v27 = vpack.c.bf16 %v3570_v26, %v3568_v24  ;;  %v1125_v24 = vld [vmem:[%s5749_s5 + $0x88] sm:$0xff] }
  0xa0   :  { %3010 = vmatmul.msk.bf16.gmra.mxu0 %vm646_vm1, %v3427_v23  ;;  %v4117_v33 = vpop.permute.xlu0 %243  ;;  %3571 = vtanh.f32 %v762_v28  ;;  %v1126_v23 = vld [vmem:[%s5749_s5 + $0x90] sm:$0xff] }
  0xa5   :  { %v763_v34 = vpop.f32.mrf.mxu0  ;;  %453 = vperm.xlu2 %3566, %v159_v29   ;;  %v1130_v29 = vld [vmem:[%s5749_s5 + $0xb0] sm:$0xff] }
  0xa6   :  { %v764_v35 = vadd.f32 %v763_v34, %v184_v30  ;;  %448 = vperm.xlu1 %3565, %v158_v31   ;;  %463 = vperm.xlu0 %3564, %v161_v32   ;;  %v3572_v41 = vpop.eup %3571  ;;  %v1129_v30 = vld [vmem:[%s5749_s5 + $0xa8] sm:$0xff]  ;;  %v1128_v31 = vld [vmem:[%s5749_s5 + $0xa0] sm:$0xff] }
  0xa8   :  { %3573 = vtanh.f32 %v764_v35  ;;  %v4131_v44 = vpop.permute.xlu0 %258  ;;  %v1133_v35 = vld [vmem:[%s5749_s5 + $0xc8] sm:$0xff] }
  0xad   :  { %v766_v42 = vpop.f32.mrf.mxu0  ;;  %1163 = vperm.xlu2 %3566, %v1109_v37   ;;  %v1131_v37 = vld [vmem:[%s5749_s5 + $0xb8] sm:$0xff] }
  0xae   :  { %v3574_v43 = vpop.eup %3573  ;;  %1158 = vperm.xlu1 %3565, %v1108_v38   ;;  %443 = vperm.xlu0 %3564, %v157_v39   ;;  %v767_v46 = vadd.f32 %v766_v42, %v189_v36  ;;  %v1132_v36 = vld [vmem:[%s5749_s5 + $0xc0] sm:$0xff]  ;;  %v3432_v38 = vld [vmem:[%s5746_s2 + $0x70] sm:$0xff]  ;;  %v1135_v42 = vld [vmem:[%s5749_s5 + $0xd8] sm:$0xff] }
  0xaf   :  { %v4133_v45 = vpack.c.bf16 %v3574_v43, %v3572_v41  ;;  %v1136_v41 = vld [vmem:[%s5749_s5 + $0xe0] sm:$0xff]  ;;  %v1134_v43 = vld [vmem:[%s5749_s5 + $0xd0] sm:$0xff] }
  0xb0   :  { %3011 = vmatmul.msk.bf16.gmra.mxu0 %vm646_vm1, %v3428_v40  ;;  %3575 = vtanh.f32 %v767_v46  ;;  %v4145_v53 = vpop.permute.xlu0 %273  ;;  %v209_v40 = vpop.permute.xlu2 %208 }
  0xb5   :  { %v768_v51 = vpop.f32.mrf.mxu0  ;;  %1178 = vperm.xlu2 %3566, %v1112_v47  }
  0xb6   :  { %v769_v52 = vadd.f32 %v768_v51, %v194_v50  ;;  %1173 = vperm.xlu1 %3565, %v1111_v48   ;;  %1168 = vperm.xlu0 %3564, %v1110_v49   ;;  %v3576_v58 = vpop.eup %3575  ;;  %v219_v49 = vpop.permute.xlu1 %218  ;;  %v1139_v50 = vld [vmem:[%s5749_s5 + $0xf8] sm:$0xff]  ;;  %v1138_v51 = vld [vmem:[%s5749_s5 + $0xf0] sm:$0xff] }
  0xb8   :  { %3577 = vtanh.f32 %v769_v52  ;;  %v4162_v62 = vpop.permute.xlu0 %288  ;;  %v224_v48 = vpop.permute.xlu2 %223  ;;  %v1137_v52 = vld [vmem:[%s5749_s5 + $0xe8] sm:$0xff] }
  0xbd   :  { %v771_v59 = vpop.f32.mrf.mxu0  ;;  %1193 = vperm.xlu2 %3566, %v1115_v54   ;;  %v3433_v54 = vld [vmem:[%s5746_s2 + $0x78] sm:$0xff] }
  0xbe   :  { %v3578_v60 = vpop.eup %3577  ;;  %1188 = vperm.xlu1 %3565, %v1114_v55   ;;  %1183 = vperm.xlu0 %3564, %v1113_v56   ;;  %v772_v63 = vadd.f32 %v771_v59, %v4065_v5  ;;  %v1121_v5 = vld [vmem:[%s5749_s5 + $0x68] sm:$0xff] }
  0xbf   :  { %v4159_v61 = vpack.c.bf16 %v3578_v60, %v3576_v58  ;;  %v234_v58 = vpop.permute.xlu1 %233  ;;  %v1142_v60 = vld [vmem:[%s5749_s5 + $0x110] sm:$0xff] }
  0xc0   :  { %3012 = vmatmul.msk.bf16.gmra.mxu0 %vm646_vm1, %v3429_v57  ;;  %3579 = vtanh.f32 %v772_v63  ;;  %v4186_v12 = vpop.permute.xlu0 %303  ;;  %v239_v57 = vpop.permute.xlu2 %238  ;;  %v1141_v63 = vld [vmem:[%s5749_s5 + $0x108] sm:$0xff] }
  0xc5   :  { %v773_v4 = vpop.f32.mrf.mxu0  ;;  %1208 = vperm.xlu2 %3566, %v1118_v0   ;;  %v1140_v0 = vld [vmem:[%s5749_s5 + $0x100] sm:$0xff] }
  0xc6   :  { %v774_v6 = vadd.f32 %v773_v4, %v204_v3  ;;  %1203 = vperm.xlu1 %3565, %v1117_v1   ;;  %1198 = vperm.xlu0 %3564, %v1116_v2   ;;  %v3580_v10 = vpop.eup %3579 }
  0xc8   :  { %3581 = vtanh.f32 %v774_v6  ;;  %v4204_v21 = vpop.permute.xlu0 %318 }
  0xcd   :  { %v4188_v13 = vpop.f32.mrf.mxu0  ;;  %1223 = vperm.xlu2 %3566, %v1121_v5  }
  0xce   :  { %v3582_v14 = vpop.eup %3581  ;;  %1218 = vperm.xlu1 %3565, %v1120_v7   ;;  %1213 = vperm.xlu0 %3564, %v1119_v8   ;;  %v1145_v7 = vld [vmem:[%s5749_s5 + $0x128] sm:$0xff] }
  0xcf   :  { %v4190_v15 = vpack.c.bf16 %v3582_v14, %v3580_v10  ;;  %v249_v14 = vpop.permute.xlu1 %248 }
  0xd0   :  { %3013 = vmatmul.msk.bf16.gmra.mxu0 %vm646_vm1, %v3430_v9  ;;  %v4221_v28 = vpop.permute.xlu0 %333  ;;  %v3434_v9 = vld [vmem:[%s5746_s2 + $0x80] sm:$0xff] }
  0xd5   :  { %v4202_v20 = vpop.f32.mrf.mxu0  ;;  %1238 = vperm.xlu2 %3566, %v1124_v16  }
  0xd6   :  { %1233 = vperm.xlu1 %3565, %v1123_v17   ;;  %1228 = vperm.xlu0 %3564, %v1122_v18   ;;  %v779_v18 = vadd.f32 %v4202_v20, %v4080_v11  ;;  %v1148_v20 = vld [vmem:[%s5749_s5 + $0x140] sm:$0xff] }
  0xd8   :  { %v4232_v34 = vpop.permute.xlu0 %348 }
  0xdd   :  { %v4218_v26 = vpop.f32.mrf.mxu0  ;;  %1253 = vperm.xlu2 %3566, %v1127_v22  }
  0xde   :  { %1248 = vperm.xlu1 %3565, %v1126_v23   ;;  %1243 = vperm.xlu0 %3564, %v1125_v24   ;;  %v782_v8 = vadd.f32 %v4218_v26, %v219_v49 }
  0xe0   :  { %3014 = vmatmul.msk.bf16.gmra.mxu0 %vm646_vm1, %v3431_v25  ;;  %v4256_v46 = vpop.permute.xlu0 %363  ;;  %v777_v25 = vadd.f32 %v4188_v13, %v209_v40  ;;  %v1147_v13 = vld [vmem:[%s5749_s5 + $0x138] sm:$0xff] }
  0xe5   :  { %v783_v32 = vpop.f32.mrf.mxu0  ;;  %1268 = vperm.xlu2 %3566, %v1130_v29  }
  0xe6   :  { %1263 = vperm.xlu1 %3565, %v1129_v30   ;;  %1258 = vperm.xlu0 %3564, %v1128_v31   ;;  %v784_v5 = vadd.f32 %v783_v32, %v224_v48  ;;  %v1146_v31 = vld [vmem:[%s5749_s5 + $0x130] sm:$0xff]  ;;  %v254_v32 = vpop.permute.xlu2 %253  ;;  %v3435_v48 = vld [vmem:[%s5746_s2 + $0x88] sm:$0xff] }
  0xe8   :  { %v4270_v56 = vpop.permute.xlu0 %378 }
  0xed   :  { %v786_v39 = vpop.f32.mrf.mxu0  ;;  %1283 = vperm.xlu2 %3566, %v1133_v35  }
  0xee   :  { %1278 = vperm.xlu1 %3565, %v1132_v36   ;;  %1273 = vperm.xlu0 %3564, %v1131_v37   ;;  %v787_v4 = vadd.f32 %v786_v39, %v4091_v19  ;;  %v1143_v19 = vld [vmem:[%s5749_s5 + $0x118] sm:$0xff] }
  0xf0   :  { %3015 = vmatmul.msk.bf16.gmra.mxu0 %vm646_vm1, %v3432_v38  ;;  %v4284_v6 = vpop.permute.xlu0 %393 }
  0xf5   :  { %v788_v47 = vpop.f32.mrf.mxu0  ;;  %1298 = vperm.xlu2 %3566, %v1136_v41  }
  0xf6   :  { %1293 = vperm.xlu1 %3565, %v1135_v42   ;;  %1288 = vperm.xlu0 %3564, %v1134_v43   ;;  %v789_v2 = vadd.f32 %v788_v47, %v234_v58  ;;  %v1151_v42 = vld [vmem:[%s5749_s5 + $0x158] sm:$0xff]  ;;  %v1150_v43 = vld [vmem:[%s5749_s5 + $0x150] sm:$0xff]  ;;  %v1149_v47 = vld [vmem:[%s5749_s5 + $0x148] sm:$0xff] }
  0xf7   :  { %v1153_v58 = vld [vmem:[%s5749_s5 + $0x168] sm:$0xff] }
  0xf8   :  { %v4303_v29 = vpop.permute.xlu0 %408 }
  0xfd   :  { %v791_v55 = vpop.f32.mrf.mxu0  ;;  %1313 = vperm.xlu2 %3566, %v1139_v50  }
  0xfe   :  { %1308 = vperm.xlu1 %3565, %v1138_v51   ;;  %1303 = vperm.xlu0 %3564, %v1137_v52   ;;  %v792_v59 = vadd.f32 %v791_v55, %v239_v57  ;;  %v1154_v57 = vld [vmem:[%s5749_s5 + $0x170] sm:$0xff] }
 0x100   :  { %3016 = vmatmul.msk.bf16.gmra.mxu0 %vm646_vm1, %v3433_v54  ;;  %3583 = vtanh.f32 %v792_v59  ;;  %v4328_v50 = vpop.permute.xlu0 %423  ;;  %v1152_v59 = vld [vmem:[%s5749_s5 + $0x160] sm:$0xff] }
 0x105   :  { %v793_v1 = vpop.f32.mrf.mxu0  ;;  %1328 = vperm.xlu2 %3566, %v1142_v60   ;;  %v264_v60 = vpop.permute.xlu1 %263 }
 0x106   :  { %v794_v3 = vadd.f32 %v793_v1, %v4117_v33  ;;  %1323 = vperm.xlu1 %3565, %v1141_v63   ;;  %1318 = vperm.xlu0 %3564, %v1140_v0   ;;  %v1144_v33 = vld [vmem:[%s5749_s5 + $0x120] sm:$0xff]  ;;  %v3584_v10 = vpop.eup %3583  ;;  %v3452_v1 = vld [vmem:[%s5748_s4 + $0xc] sm:$0xf0] }
 0x107   :  { %v3035_v0 = vld [vmem:[%s5748_s4] sm:$0xf] }
 0x108   :  { %3585 = vtanh.f32 %v794_v3  ;;  %v3291_v3 = vld [vmem:[%s5748_s4 + $0x200] sm:$0xf] }
 0x109   :  { %3587 = vtanh.f32 %v789_v2  ;;  %v3484_v2 = vld [vmem:[%s5748_s4 + $0x10c] sm:$0xf0] }
 0x10a   :  { %3589 = vtanh.f32 %v787_v4  ;;  %v3516_v4 = vld [vmem:[%s5748_s4 + $0x20c] sm:$0xf0] }
 0x10b   :  { %3591 = vtanh.f32 %v784_v5  ;;  %v2441_v5 = vld [vmem:[%s5750_s6 + $0x8] sm:$0xff] }
 0x10c   :  { %3593 = vtanh.f32 %v782_v8  ;;  %v3436_v8 = vld [vmem:[%s5746_s2 + $0x90] sm:$0xff] }
 0x10d   :  { %v796_v16 = vpop.f32.mrf.mxu0  ;;  %1343 = vperm.xlu2 %3566, %v1145_v7   ;;  %3595 = vtanh.f32 %v779_v18  ;;  %v1155_v7 = vld [vmem:[%s5749_s5 + $0x178] sm:$0xff] }
 0x10e   :  { %v3586_v17 = vpop.eup %3585  ;;  %v797_v22 = vadd.f32 %v796_v16, %v249_v14  ;;  %1338 = vperm.xlu1 %3565, %v1144_v33   ;;  %1333 = vperm.xlu0 %3564, %v1143_v19   ;;  %3597 = vtanh.f32 %v777_v25  ;;  %v3036_v33 = vor.u32 %v3452_v1, %v3035_v0  ;;  %v3292_v14 = vor.u32 %v3516_v4, %v3291_v3  ;;  %v2442_v25 = vld [vmem:[%s5750_s6 + $0x10] sm:$0xff]  ;;  %v3195_v3 = vld [vmem:[%s5748_s4 + $0x140] sm:$0xf] }
 0x10f   :  { %v1083_v23 = vpack.c.bf16 %v3586_v17, %v3584_v10  ;;  %v3588_v24 = vpop.eup %3587  ;;  %v3492_v4 = vld [vmem:[%s5748_s4 + $0x14c] sm:$0xf0] }
 0x110   :  { %3017 = vmatmul.msk.bf16.gmra.mxu0 %vm646_vm1, %v3434_v9  ;;  %v3590_v26 = vpop.eup %3589  ;;  %3599 = vtanh.f32 %v797_v22  ;;  %v269_v22 = vpop.permute.xlu2 %268 }
 0x111   :  { %1876 = vmatpush.bf16.msra.mxu1 %v1083_v23  ;;  %3546 = vmatpush.bf16.msra.mxu2 %v1083_v23  ;;  %v1082_v11 = vpack.c.bf16 %v3588_v24, %v3590_v26  ;;  %v3592_v30 = vpop.eup %3591  ;;  %v2444_v24 = vld [vmem:[%s5750_s6 + $0x20] sm:$0xff] }
 0x112   :  { %3547 = vmatpush.bf16.msra.mxu3 %v1083_v23  ;;  %v3594_v36 = vpop.eup %3593 }
 0x113   :  { %v1081_v38 = vpack.c.bf16 %v3592_v30, %v3594_v36  ;;  %v3596_v39 = vpop.eup %3595  ;;  %v3456_v30 = vld [vmem:[%s5748_s4 + $0x2c] sm:$0xf0]  ;;  %v2447_v36 = vld [vmem:[%s5750_s6 + $0x38] sm:$0xff] }
 0x114   :  { %v3598_v40 = vpop.eup %3597 }
 0x115   :  { %v798_v35 = vpop.f32.mrf.mxu0  ;;  %1877 = vmatpush.bf16.msra.mxu1 %v1082_v11  ;;  %3548 = vmatpush.bf16.msra.mxu2 %v1082_v11  ;;  %v1080_v41 = vpack.c.bf16 %v3596_v39, %v3598_v40  ;;  %v3437_v39 = vld [vmem:[%s5746_s2 + $0x98] sm:$0xff] }
 0x116   :  { %v799_v37 = vadd.f32 %v798_v35, %v254_v32  ;;  %3549 = vmatpush.bf16.msra.mxu3 %v1082_v11  ;;  %1358 = vperm.xlu2 %3566, %v1148_v20   ;;  %v4326_v49 = vpop.eup %3599  ;;  %v3051_v20 = vld [vmem:[%s5748_s4 + $0x20] sm:$0xf]  ;;  %v3520_v32 = vld [vmem:[%s5748_s4 + $0x22c] sm:$0xf0] }
 0x117   :  { %1353 = vperm.xlu1 %3565, %v1147_v13   ;;  %1348 = vperm.xlu0 %3564, %v1146_v31   ;;  %v3179_v13 = vld [vmem:[%s5748_s4 + $0x120] sm:$0xf]  ;;  %v3052_v40 = vor.u32 %v3456_v30, %v3051_v20  ;;  %v2455_v20 = vld [vmem:[%s5750_s6 + $0x78] sm:$0xff]  ;;  %v2454_v30 = vld [vmem:[%s5750_s6 + $0x70] sm:$0xff] }
 0x118   :  { %3601 = vtanh.f32 %v799_v37  ;;  %v3307_v31 = vld [vmem:[%s5748_s4 + $0x220] sm:$0xf]  ;;  %v2446_v37 = vld [vmem:[%s5750_s6 + $0x30] sm:$0xff] }
 0x119   :  { %1878 = vmatpush.bf16.msra.mxu1 %v1081_v38  ;;  %3550 = vmatpush.bf16.msra.mxu2 %v1081_v38 }
 0x11a   :  { %3551 = vmatpush.bf16.msra.mxu3 %v1081_v38  ;;  %v2445_v38 = vld [vmem:[%s5750_s6 + $0x28] sm:$0xff] }
 0x11d   :  { %v801_v51 = vpop.f32.mrf.mxu0  ;;  %1879 = vmatpush.bf16.msra.mxu1 %v1080_v41  ;;  %3552 = vmatpush.bf16.msra.mxu2 %v1080_v41 }
 0x11e   :  { %v4330_v52 = vpop.eup %3601  ;;  %3553 = vmatpush.bf16.msra.mxu3 %v1080_v41  ;;  %1373 = vperm.xlu2 %3566, %v1151_v42   ;;  %v802_v55 = vadd.f32 %v801_v51, %v4131_v44  ;;  %v4351_v44 = vpop.permute.xlu0 %438 }
 0x11f   :  { %1368 = vperm.xlu1 %3565, %v1150_v43   ;;  %1363 = vperm.xlu0 %3564, %v1149_v47   ;;  %v1084_v54 = vpack.c.bf16 %v4330_v52, %v4326_v49  ;;  %v3308_v47 = vor.u32 %v3520_v32, %v3307_v31  ;;  %v3083_v31 = vld [vmem:[%s5748_s4 + $0x60] sm:$0xf]  ;;  %v3464_v32 = vld [vmem:[%s5748_s4 + $0x6c] sm:$0xf0]  ;;  %v3454_v52 = vld [vmem:[%s5748_s4 + $0x24] sm:$0xf] }
 0x120   :  { %3018 = vmatmul.msk.bf16.gmra.mxu0 %vm646_vm1, %v3435_v48  ;;  %3603 = vtanh.f32 %v802_v55  ;;  %v279_v55 = vpop.permute.xlu1 %278 }
 0x121   :  { %1880 = vmatpush.bf16.msra.mxu1 %v4190_v15  ;;  %3554 = vmatpush.bf16.msra.mxu2 %v4190_v15 }
 0x122   :  { %3555 = vmatpush.bf16.msra.mxu3 %v4190_v15 }
 0x125   :  { %v803_v63 = vpop.f32.mrf.mxu0  ;;  %1881 = vmatpush.bf16.msra.mxu1 %v4159_v61  ;;  %3556 = vmatpush.bf16.msra.mxu2 %v4159_v61 }
 0x126   :  { %v804_v15 = vadd.f32 %v803_v63, %v264_v60  ;;  %3557 = vmatpush.bf16.msra.mxu3 %v4159_v61  ;;  %1388 = vperm.xlu2 %3566, %v1154_v57   ;;  %v3163_v61 = vld [vmem:[%s5748_s4 + $0x100] sm:$0xf]  ;;  %v4386_v19 = vpop.eup %3603  ;;  %v4396_v18 = vpop.permute.xlu0 %468  ;;  %v2449_v60 = vld [vmem:[%s5750_s6 + $0x48] sm:$0xff] }
 0x127   :  { %1383 = vperm.xlu1 %3565, %v1153_v58   ;;  %1378 = vperm.xlu0 %3564, %v1152_v59   ;;  %v3164_v10 = vor.u32 %v3484_v2, %v3163_v61  ;;  %v2450_v58 = vld [vmem:[%s5750_s6 + $0x50] sm:$0xff]  ;;  %v284_v59 = vpop.permute.xlu2 %283  ;;  %v2448_v63 = vld [vmem:[%s5750_s6 + $0x40] sm:$0xff] }
 0x128   :  { %3605 = vtanh.f32 %v804_v15  ;;  %v3067_v61 = vld [vmem:[%s5748_s4 + $0x40] sm:$0xf]  ;;  %v3460_v2 = vld [vmem:[%s5748_s4 + $0x4c] sm:$0xf0] }
 0x129   :  { %1882 = vmatpush.bf16.msra.mxu1 %v4133_v45  ;;  %3558 = vmatpush.bf16.msra.mxu2 %v4133_v45 }
 0x12a   :  { %3559 = vmatpush.bf16.msra.mxu3 %v4133_v45  ;;  %v2440_v45 = vld [vmem:[%s5750_s6] sm:$0xff] }
 0x12d   :  { %v806_v9 = vpop.f32.mrf.mxu0  ;;  %1883 = vmatpush.bf16.msra.mxu1 %v4105_v27  ;;  %3560 = vmatpush.bf16.msra.mxu2 %v4105_v27 }
 0x12e   :  { %v4390_v16 = vpop.eup %3605  ;;  %3561 = vmatpush.bf16.msra.mxu3 %v4105_v27  ;;  %2495 = vperm.xlu2 %3566, %v2441_v5   ;;  %v807_v23 = vadd.f32 %v806_v9, %v269_v22  ;;  %v2443_v27 = vld [vmem:[%s5750_s6 + $0x18] sm:$0xff]  ;;  %v4426_v35 = vpop.permute.xlu0 %463  ;;  %v3323_v5 = vld [vmem:[%s5748_s4 + $0x240] sm:$0xf] }
 0x12f   :  { %2490 = vperm.xlu1 %3565, %v2440_v45   ;;  %1393 = vperm.xlu0 %3564, %v1155_v7   ;;  %v1085_v17 = vpack.c.bf16 %v4390_v16, %v4386_v19  ;;  %v3524_v45 = vld [vmem:[%s5748_s4 + $0x24c] sm:$0xf0]  ;;  %v2453_v7 = vld [vmem:[%s5750_s6 + $0x68] sm:$0xff]  ;;  %v3438_v9 = vld [vmem:[%s5746_s2 + $0xa0] sm:$0xff] }
 0x130   :  { %3019 = vmatmul.msk.bf16.gmra.mxu0 %vm646_vm1, %v3436_v8  ;;  %1884 = vmatmul.bf16.vlgmr.msra.gmra.mxu1 %v3036_v33  ;;  %3607 = vtanh.f32 %v807_v23  ;;  %v2452_v8 = vld [vmem:[%s5750_s6 + $0x60] sm:$0xff]  ;;  %v2451_v33 = vld [vmem:[%s5750_s6 + $0x58] sm:$0xff]  ;;  %v3196_v23 = vor.u32 %v3492_v4, %v3195_v3  ;;  %v3468_v3 = vld [vmem:[%s5748_s4 + $0x8c] sm:$0xf0] }
 0x131   :  { %1924 = vmatmul.bf16.vlgmr.msra.gmra.mxu2 %v3164_v10  ;;  %1964 = vmatmul.bf16.vlgmr.msra.gmra.mxu3 %v3292_v14  ;;  %v3068_v10 = vor.u32 %v3460_v2, %v3067_v61  ;;  %v3099_v2 = vld [vmem:[%s5748_s4 + $0x80] sm:$0xf] }
 0x132   :  { %v3227_v4 = vld [vmem:[%s5748_s4 + $0x180] sm:$0xf] }
 0x135   :  { %v808_v26 = vpop.f32.mrf.mxu0 }
 0x136   :  { %v809_v11 = vadd.f32 %v808_v26, %v4145_v53  ;;  %2510 = vperm.xlu2 %3566, %v2444_v24   ;;  %v3488_v53 = vld [vmem:[%s5748_s4 + $0x12c] sm:$0xf0]  ;;  %v4440_v41 = vpop.eup %3607  ;;  %v4456_v15 = vpop.permute.xlu0 %443  ;;  %v3324_v24 = vor.u32 %v3524_v45, %v3323_v5  ;;  %v3355_v45 = vld [vmem:[%s5748_s4 + $0x280] sm:$0xf] }
 0x137   :  { %2505 = vperm.xlu1 %3565, %v2443_v27   ;;  %2500 = vperm.xlu0 %3564, %v2442_v25   ;;  %v3180_v43 = vor.u32 %v3488_v53, %v3179_v13  ;;  %v3500_v5 = vld [vmem:[%s5748_s4 + $0x18c] sm:$0xf0] }
 0x138   :  { %3609 = vtanh.f32 %v809_v11  ;;  %v2456_v11 = vld [vmem:[%s5750_s6 + $0x80] sm:$0xff] }
 0x13d   :  { %v811_v42 = vpop.f32.mrf.mxu0 }
 0x13e   :  { %v4442_v48 = vpop.eup %3609  ;;  %2525 = vperm.xlu2 %3566, %v2447_v36   ;;  %v812_v57 = vadd.f32 %v811_v42, %v279_v55  ;;  %v4494_v25 = vpop.permute.xlu0 %1168  ;;  %v3211_v36 = vld [vmem:[%s5748_s4 + $0x160] sm:$0xf]  ;;  %v2458_v42 = vld [vmem:[%s5750_s6 + $0x90] sm:$0xff]  ;;  %v3084_v55 = vor.u32 %v3464_v32, %v3083_v31 }
 0x13f   :  { %2520 = vperm.xlu1 %3565, %v2446_v37   ;;  %2515 = vperm.xlu0 %3564, %v2445_v38   ;;  %v1086_v51 = vpack.c.bf16 %v4442_v48, %v4440_v41  ;;  %v3496_v37 = vld [vmem:[%s5748_s4 + $0x16c] sm:$0xf0]  ;;  %v3339_v38 = vld [vmem:[%s5748_s4 + $0x260] sm:$0xf]  ;;  %v4591_v31 = vpop.permute.xlu1 %293  ;;  %v3037_v41 = vld [vmem:[%s5748_s4 + $0x10] sm:$0xf0] }
 0x140   :  { %3020 = vmatmul.msk.bf16.gmra.mxu0 %vm646_vm1, %v3437_v39  ;;  %1889 = vmatmul.bf16.gmra.mxu1 %v3052_v40  ;;  %3611 = vtanh.f32 %v812_v57  ;;  %v3528_v39 = vld [vmem:[%s5748_s4 + $0x26c] sm:$0xf0]  ;;  %v2459_v40 = vld [vmem:[%s5750_s6 + $0x98] sm:$0xff]  ;;  %v2468_v32 = vld [vmem:[%s5750_s6 + $0xe0] sm:$0xff] }
 0x141   :  { %1929 = vmatmul.bf16.gmra.mxu2 %v3180_v43  ;;  %1969 = vmatmul.bf16.gmra.mxu3 %v3308_v47  ;;  %v2457_v43 = vld [vmem:[%s5750_s6 + $0x88] sm:$0xff]  ;;  %v2829_v48 = vld [vmem:[#allocation2] sm:$0x1] }
 0x142   :  { %v3439_v47 = vld [vmem:[%s5746_s2 + $0xa8] sm:$0xff] }
 0x145   :  { %v813_v0 = vpop.f32.mrf.mxu0 }
 0x146   :  { %v814_v1 = vadd.f32 %v813_v0, %v284_v59  ;;  %2540 = vperm.xlu2 %3566, %v2450_v58   ;;  %v4488_v14 = vpop.eup %3611  ;;  %v4510_v53 = vpop.permute.xlu0 %1183  ;;  %v3212_v58 = vor.u32 %v3496_v37, %v3211_v36  ;;  %v3340_v59 = vor.u32 %v3528_v39, %v3339_v38  ;;  %v2461_v0 = vld [vmem:[%s5750_s6 + $0xa8] sm:$0xff]  ;;  %v2467_v36 = vld [vmem:[%s5750_s6 + $0xd8] sm:$0xff]  ;;  %v2466_v37 = vld [vmem:[%s5750_s6 + $0xd0] sm:$0xff] }
 0x147   :  { %2535 = vperm.xlu1 %3565, %v2449_v60   ;;  %2530 = vperm.xlu0 %3564, %v2448_v63   ;;  %v2462_v63 = vld [vmem:[%s5750_s6 + $0xb0] sm:$0xff] }
 0x148   :  { %3613 = vtanh.f32 %v814_v1  ;;  %v2460_v1 = vld [vmem:[%s5750_s6 + $0xa0] sm:$0xff] }
 0x14d   :  { %v4490_v22 = vpop.f32.mrf.mxu0 }
 0x14e   :  { %v4492_v27 = vpop.eup %3613  ;;  %2555 = vperm.xlu2 %3566, %v2453_v7   ;;  %v4545_v60 = vpop.permute.xlu0 %1198  ;;  %v3532_v7 = vld [vmem:[%s5748_s4 + $0x28c] sm:$0xf0] }
 0x14f   :  { %2550 = vperm.xlu1 %3565, %v2452_v8   ;;  %2545 = vperm.xlu0 %3564, %v2451_v33   ;;  %v1087_v26 = vpack.c.bf16 %v4492_v27, %v4488_v14  ;;  %v2465_v8 = vld [vmem:[%s5750_s6 + $0xc8] sm:$0xff]  ;;  %v2464_v33 = vld [vmem:[%s5750_s6 + $0xc0] sm:$0xff] }
 0x150   :  { %3021 = vmatmul.msk.bf16.gmra.mxu0 %vm646_vm1, %v3438_v9  ;;  %1894 = vmatmul.bf16.gmra.mxu1 %v3068_v10  ;;  %v2463_v9 = vld [vmem:[%s5750_s6 + $0xb8] sm:$0xff]  ;;  %v3440_v10 = vld [vmem:[%s5746_s2 + $0xb0] sm:$0xff]  ;;  %v3450_v27 = vld [vmem:[%s5748_s4 + $0x4] sm:$0xf] }
 0x151   :  { %1934 = vmatmul.bf16.gmra.mxu2 %v3196_v23  ;;  %1974 = vmatmul.bf16.gmra.mxu3 %v3324_v24  ;;  %v3100_v23 = vor.u32 %v3468_v3, %v3099_v2  ;;  %v2469_v2 = vld [vmem:[%s5750_s6 + $0xe8] sm:$0xff]  ;;  %v3441_v3 = vld [vmem:[%s5746_s2 + $0xb8] sm:$0xff]  ;;  %v3040_v16 = vor.u32 %v3450_v27, %v3037_v41  ;;  %v3462_v27 = vld [vmem:[%s5748_s4 + $0x64] sm:$0xf] }
 0x152   :  { %v3085_v41 = vld [vmem:[%s5748_s4 + $0x70] sm:$0xf0] }
 0x155   :  { %v4508_v13 = vpop.f32.mrf.mxu0 }
 0x156   :  { %2570 = vperm.xlu2 %3566, %v2456_v11   ;;  %v4588_v24 = vpop.permute.xlu0 %1213 }
 0x157   :  { %2565 = vperm.xlu1 %3565, %v2455_v20   ;;  %2560 = vperm.xlu0 %3564, %v2454_v30   ;;  %5753 = vst [vmem:[#allocation6_spill] sm:$0xff] %v4588_v24  ;;  %v3228_v20 = vor.u32 %v3500_v5, %v3227_v4  ;;  %v3356_v30 = vor.u32 %v3532_v7, %v3355_v45 }
 0x15d   :  { %v4542_v57 = vpop.f32.mrf.mxu0 }
 0x15e   :  { %2585 = vperm.xlu2 %3566, %v2459_v40   ;;  %v4602_v39 = vpop.permute.xlu0 %1228  ;;  %v299_v40 = vpop.permute.xlu2 %298 }
 0x15f   :  { %2580 = vperm.xlu1 %3565, %v2458_v42   ;;  %2575 = vperm.xlu0 %3564, %v2457_v43   ;;  %v3115_v42 = vld [vmem:[%s5748_s4 + $0xa0] sm:$0xf]  ;;  %v3472_v43 = vld [vmem:[%s5748_s4 + $0xac] sm:$0xf0] }
 0x160   :  { %3022 = vmatmul.msk.bf16.gmra.mxu0 %vm646_vm1, %v3439_v47  ;;  %1899 = vmatmul.bf16.gmra.mxu1 %v3084_v55  ;;  %v3243_v47 = vld [vmem:[%s5748_s4 + $0x1a0] sm:$0xf]  ;;  %v3504_v55 = vld [vmem:[%s5748_s4 + $0x1ac] sm:$0xf0]  ;;  %v3116_v4 = vor.u32 %v3472_v43, %v3115_v42 }
 0x161   :  { %1939 = vmatmul.bf16.gmra.mxu2 %v3212_v58  ;;  %1979 = vmatmul.bf16.gmra.mxu3 %v3340_v59  ;;  %v3371_v58 = vld [vmem:[%s5748_s4 + $0x2a0] sm:$0xf]  ;;  %v3536_v59 = vld [vmem:[%s5748_s4 + $0x2ac] sm:$0xf0]  ;;  %v3244_v45 = vor.u32 %v3504_v55, %v3243_v47 }
 0x162   :  { %v3372_v7 = vor.u32 %v3536_v59, %v3371_v58  ;;  %v3131_v42 = vld [vmem:[%s5748_s4 + $0xc0] sm:$0xf]  ;;  %v3476_v43 = vld [vmem:[%s5748_s4 + $0xcc] sm:$0xf0] }
 0x163   :  { %v3259_v47 = vld [vmem:[%s5748_s4 + $0x1c0] sm:$0xf]  ;;  %v3540_v55 = vld [vmem:[%s5748_s4 + $0x2cc] sm:$0xf0] }
 0x165   :  { %v4556_v61 = vpop.f32.mrf.mxu0 }
 0x166   :  { %2600 = vperm.xlu2 %3566, %v2462_v63   ;;  %v309_v63 = vpop.permute.xlu1 %308  ;;  %v824_v59 = vadd.f32 %v4556_v61, %v4186_v12  ;;  %v822_v61 = vadd.f32 %v4542_v57, %v299_v40  ;;  %v817_v57 = vadd.f32 %v4490_v22, %v4162_v62 }
 0x167   :  { %2595 = vperm.xlu1 %3565, %v2461_v0   ;;  %2590 = vperm.xlu0 %3564, %v2460_v1   ;;  %v2471_v0 = vld [vmem:[%s5750_s6 + $0xf8] sm:$0xff]  ;;  %v2470_v1 = vld [vmem:[%s5750_s6 + $0xf0] sm:$0xff] }
 0x16d   :  { %v826_v11 = vpop.f32.mrf.mxu0 }
 0x16e   :  { %2615 = vperm.xlu2 %3566, %v2465_v8   ;;  %v4635_v8 = vpop.permute.xlu0 %1243 }
 0x16f   :  { %2610 = vperm.xlu1 %3565, %v2464_v33   ;;  %2605 = vperm.xlu0 %3564, %v2463_v9   ;;  %v314_v33 = vpop.permute.xlu2 %313 }
 0x170   :  { %3023 = vmatmul.msk.bf16.gmra.mxu0 %vm646_vm1, %v3440_v10  ;;  %1904 = vmatmul.bf16.gmra.mxu1 %v3100_v23  ;;  %v2474_v10 = vld [vmem:[%s5750_s6 + $0x110] sm:$0xff]  ;;  %v2473_v23 = vld [vmem:[%s5750_s6 + $0x108] sm:$0xff] }
 0x171   :  { %1944 = vmatmul.bf16.gmra.mxu2 %v3228_v20  ;;  %1984 = vmatmul.bf16.gmra.mxu3 %v3356_v30  ;;  %v2472_v20 = vld [vmem:[%s5750_s6 + $0x100] sm:$0xff]  ;;  %v324_v30 = vpop.permute.xlu1 %323 }
 0x175   :  { %v828_v38 = vpop.f32.mrf.mxu0 }
 0x176   :  { %2630 = vperm.xlu2 %3566, %v2468_v32   ;;  %v4665_v58 = vpop.permute.xlu0 %1258 }
 0x177   :  { %2625 = vperm.xlu1 %3565, %v2467_v36   ;;  %2620 = vperm.xlu0 %3564, %v2466_v37   ;;  %v829_v37 = vadd.f32 %v828_v38, %v314_v33  ;;  %v3508_v38 = vld [vmem:[%s5748_s4 + $0x1cc] sm:$0xf0]  ;;  %v329_v12 = vpop.permute.xlu2 %328 }
 0x17d   :  { %v831_v5 = vpop.f32.mrf.mxu0 }
 0x17e   :  { %2645 = vperm.xlu2 %3566, %v2471_v0   ;;  %v832_v9 = vadd.f32 %v831_v5, %v4204_v21  ;;  %v827_v21 = vadd.f32 %v826_v11, %v309_v63  ;;  %v3387_v11 = vld [vmem:[%s5748_s4 + $0x2c0] sm:$0xf]  ;;  %v2477_v63 = vld [vmem:[%s5750_s6 + $0x128] sm:$0xff]  ;;  %v4696_v22 = vpop.permute.xlu0 %1273 }
 0x17f   :  { %2640 = vperm.xlu1 %3565, %v2470_v1   ;;  %2635 = vperm.xlu0 %3564, %v2469_v2   ;;  %v2476_v0 = vld [vmem:[%s5750_s6 + $0x120] sm:$0xff]  ;;  %v2475_v1 = vld [vmem:[%s5750_s6 + $0x118] sm:$0xff]  ;;  %5754 = vst [vmem:[#allocation7_spill] sm:$0xff] %v4696_v22 }
 0x180   :  { %3024 = vmatmul.msk.bf16.gmra.mxu0 %vm646_vm1, %v3441_v3  ;;  %1909 = vmatmul.bf16.gmra.mxu1 %v3116_v4  ;;  %3615 = vtanh.f32 %v832_v9  ;;  %v3442_v2 = vld [vmem:[%s5746_s2 + $0xc0] sm:$0xff]  ;;  %v3132_v3 = vor.u32 %v3476_v43, %v3131_v42 }
 0x181   :  { %1949 = vmatmul.bf16.gmra.mxu2 %v3244_v45  ;;  %1989 = vmatmul.bf16.gmra.mxu3 %v3372_v7  ;;  %v3260_v45 = vor.u32 %v3508_v38, %v3259_v47  ;;  %v3388_v7 = vor.u32 %v3540_v55, %v3387_v11  ;;  %v3147_v47 = vld [vmem:[%s5748_s4 + $0xe0] sm:$0xf]  ;;  %v3480_v38 = vld [vmem:[%s5748_s4 + $0xec] sm:$0xf0] }
 0x182   :  { %v3512_v11 = vld [vmem:[%s5748_s4 + $0x1ec] sm:$0xf0]  ;;  %v3403_v55 = vld [vmem:[%s5748_s4 + $0x2e0] sm:$0xf] }
 0x185   :  { %v833_v32 = vpop.f32.mrf.mxu0 }
 0x186   :  { %v834_v36 = vadd.f32 %v833_v32, %v324_v30  ;;  %2660 = vperm.xlu2 %3566, %v2474_v10   ;;  %v3616_v4 = vpop.eup %3615  ;;  %v819_v10 = vadd.f32 %v4508_v13, %v4591_v31  ;;  %v2480_v13 = vld [vmem:[%s5750_s6 + $0x140] sm:$0xff]  ;;  %v2479_v30 = vld [vmem:[%s5750_s6 + $0x138] sm:$0xff]  ;;  %v2478_v32 = vld [vmem:[%s5750_s6 + $0x130] sm:$0xff] }
 0x187   :  { %2655 = vperm.xlu1 %3565, %v2473_v23   ;;  %2650 = vperm.xlu0 %3564, %v2472_v20  }
 0x188   :  { %3617 = vtanh.f32 %v834_v36 }
 0x189   :  { %3619 = vtanh.f32 %v829_v37 }
 0x18a   :  { %3621 = vtanh.f32 %v827_v21 }
 0x18b   :  { %3623 = vtanh.f32 %v824_v59  ;;  %v3544_v59 = vld [vmem:[%s5748_s4 + $0x2ec] sm:$0xf0] }
 0x18c   :  { %3625 = vtanh.f32 %v822_v61 }
 0x18d   :  { %v836_v5 = vpop.f32.mrf.mxu0  ;;  %3627 = vtanh.f32 %v819_v10 }
 0x18e   :  { %v3618_v33 = vpop.eup %3617  ;;  %v837_v9 = vadd.f32 %v836_v5, %v329_v12  ;;  %2675 = vperm.xlu2 %3566, %v2477_v63   ;;  %3629 = vtanh.f32 %v817_v57  ;;  %v3148_v12 = vor.u32 %v3480_v38, %v3147_v47  ;;  %v2486_v57 = vld [vmem:[%s5750_s6 + $0x170] sm:$0xff] }
 0x18f   :  { %2670 = vperm.xlu1 %3565, %v2476_v0   ;;  %2665 = vperm.xlu0 %3564, %v2475_v1   ;;  %v1091_v23 = vpack.c.bf16 %v3618_v33, %v3616_v4  ;;  %v3620_v20 = vpop.eup %3619  ;;  %v2483_v0 = vld [vmem:[%s5750_s6 + $0x158] sm:$0xff]  ;;  %v3443_v4 = vld [vmem:[%s5746_s2 + $0xc8] sm:$0xff] }
 0x190   :  { %3025 = vmatmul.msk.bf16.gmra.mxu0 %vm646_vm1, %v3442_v2  ;;  %1914 = vmatmul.bf16.gmra.mxu1 %v3132_v3  ;;  %v3622_v40 = vpop.eup %3621  ;;  %3631 = vtanh.f32 %v837_v9  ;;  %v2482_v2 = vld [vmem:[%s5750_s6 + $0x150] sm:$0xff]  ;;  %v2481_v3 = vld [vmem:[%s5750_s6 + $0x148] sm:$0xff]  ;;  %v4733_v9 = vpop.permute.xlu0 %1288 }
 0x191   :  { %1954 = vmatmul.bf16.gmra.mxu2 %v3260_v45  ;;  %1994 = vmatmul.bf16.gmra.mxu3 %v3388_v7  ;;  %v1090_v31 = vpack.c.bf16 %v3620_v20, %v3622_v40  ;;  %v3624_v62 = vpop.eup %3623  ;;  %v3404_v7 = vor.u32 %v3544_v59, %v3403_v55  ;;  %5755 = vst [vmem:[#allocation8_spill] sm:$0xff] %v4733_v9  ;;  %v2485_v40 = vld [vmem:[%s5750_s6 + $0x168] sm:$0xff] }
 0x192   :  { %2005 = vmatpush.bf16.msrb.mxu2 %v1091_v23  ;;  %v3626_v21 = vpop.eup %3625  ;;  %v339_v23 = vpop.permute.xlu1 %338 }
 0x193   :  { %v1089_v42 = vpack.c.bf16 %v3624_v62, %v3626_v21  ;;  %v3628_v43 = vpop.eup %3627 }
 0x194   :  { %v3630_v63 = vpop.eup %3629 }
 0x195   :  { %v838_v36 = vpop.f32.mrf.mxu0  ;;  %v1088_v1 = vpack.c.bf16 %v3628_v43, %v3630_v63 }
 0x196   :  { %v839_v37 = vadd.f32 %v838_v36, %v4221_v28  ;;  %2006 = vmatpush.bf16.msrb.mxu2 %v1090_v31  ;;  %2690 = vperm.xlu2 %3566, %v2480_v13   ;;  %v3275_v28 = vld [vmem:[%s5748_s4 + $0x1e0] sm:$0xf]  ;;  %v4729_v61 = vpop.eup %3631  ;;  %v344_v31 = vpop.permute.xlu2 %343 }
 0x197   :  { %2685 = vperm.xlu1 %3565, %v2479_v30   ;;  %2680 = vperm.xlu0 %3564, %v2478_v32   ;;  %v3276_v45 = vor.u32 %v3512_v11, %v3275_v28  ;;  %v2484_v13 = vld [vmem:[%s5750_s6 + $0x160] sm:$0xff] }
 0x198   :  { %3633 = vtanh.f32 %v839_v37  ;;  %v4753_v14 = vpop.permute.xlu0 %1303 }
 0x199   :  { %5756 = vst [vmem:[#allocation9_spill] sm:$0xff] %v4753_v14 }
 0x19a   :  { %2007 = vmatpush.bf16.msrb.mxu2 %v1089_v42  ;;  %v354_v47 = vpop.permute.xlu1 %353 }
 0x19d   :  { %v841_v5 = vpop.f32.mrf.mxu0 }
 0x19e   :  { %v4731_v33 = vpop.eup %3633  ;;  %2008 = vmatpush.bf16.msrb.mxu2 %v1088_v1  ;;  %2705 = vperm.xlu2 %3566, %v2483_v0   ;;  %v842_v20 = vadd.f32 %v841_v5, %v339_v23 }
 0x19f   :  { %2700 = vperm.xlu1 %3565, %v2482_v2   ;;  %2695 = vperm.xlu0 %3564, %v2481_v3   ;;  %v359_v2 = vpop.permute.xlu2 %358 }
 0x1a0   :  { %3026 = vmatmul.msk.bf16.gmra.mxu0 %vm646_vm1, %v3443_v4  ;;  %1919 = vmatmul.bf16.gmra.mxu1 %v3148_v12  ;;  %3635 = vtanh.f32 %v842_v20  ;;  %v1319_v37 = vpop.permute.xlu0 %1318  ;;  %v3446_v20 = vld [vmem:[%s5746_s2 + $0xe0] sm:$0xff] }
 0x1a1   :  { %1959 = vmatmul.bf16.gmra.mxu2 %v3276_v45  ;;  %1999 = vmatmul.bf16.gmra.mxu3 %v3404_v7  ;;  %v3458_v45 = vld [vmem:[%s5748_s4 + $0x44] sm:$0xf]  ;;  %v3069_v7 = vld [vmem:[%s5748_s4 + $0x50] sm:$0xf0] }
 0x1a2   :  { %2009 = vmatpush.bf16.msrb.mxu2 %v1087_v26  ;;  %v3444_v26 = vld [vmem:[%s5746_s2 + $0xd0] sm:$0xff] }
 0x1a5   :  { %v843_v30 = vpop.f32.mrf.mxu0 }
 0x1a6   :  { %v844_v32 = vadd.f32 %v843_v30, %v344_v31  ;;  %2010 = vmatpush.bf16.msrb.mxu2 %v1086_v51  ;;  %2720 = vperm.xlu2 %3566, %v2486_v57   ;;  %v2487_v51 = vld [vmem:[%s5750_s6 + $0x178] sm:$0xff]  ;;  %v4770_v62 = vpop.eup %3635 }
 0x1a7   :  { %2715 = vperm.xlu1 %3565, %v2485_v40   ;;  %2710 = vperm.xlu0 %3564, %v2484_v13  }
 0x1a8   :  { %3637 = vtanh.f32 %v844_v32 }
 0x1aa   :  { %2011 = vmatpush.bf16.msrb.mxu2 %v1085_v17 }
 0x1ad   :  { %v846_v19 = vpop.f32.mrf.mxu0 }
 0x1ae   :  { %v4772_v17 = vpop.eup %3637  ;;  %2012 = vmatpush.bf16.msrb.mxu2 %v1084_v54  ;;  %v847_v21 = vadd.f32 %v846_v19, %v4232_v34  ;;  %v3053_v54 = vld [vmem:[%s5748_s4 + $0x30] sm:$0xf0]  ;;  %v3445_v34 = vld [vmem:[%s5746_s2 + $0xd8] sm:$0xff]  ;;  %v3088_v19 = vor.u32 %v3462_v27, %v3085_v41 }
 0x1af   :  { %2832 = vperm.xlu1 %3565, %v2829_v48   ;;  %2725 = vperm.xlu0 %3564, %v2487_v51   ;;  %v3056_v63 = vor.u32 %v3454_v52, %v3053_v54  ;;  %v3447_v51 = vld [vmem:[%s5746_s2 + $0xe8] sm:$0xff]  ;;  %v3448_v52 = vld [vmem:[%s5746_s2 + $0xf0] sm:$0xff] }
 0x1b0   :  { %3027 = vmatmul.msk.bf16.gmra.mxu0 %vm646_vm1, %v3444_v26  ;;  %3639 = vtanh.f32 %v847_v21 }
 0x1b1   :  { %2013 = vmatmul.bf16.vlgmr.msrb.gmra.mxu2 %v3040_v16  ;;  %v369_v16 = vpop.permute.xlu1 %368 }
 0x1b4   :  { %v4781_v42 = vpop.f32.mrf.mxu2  ;;  %v1965_v43 = vpop.f32.mrf.mxu3 }
 0x1b5   :  { %v4783_v38 = vadd.f32 %v1965_v43, %v1319_v37  ;;  %v848_v28 = vpop.f32.mrf.mxu0  ;;  %v3466_v43 = vld [vmem:[%s5748_s4 + $0x84] sm:$0xf] }
 0x1b6   :  { %v849_v49 = vadd.f32 %v848_v28, %v354_v47  ;;  %v4796_v55 = vpop.eup %3639  ;;  %v3101_v47 = vld [vmem:[%s5748_s4 + $0x90] sm:$0xf0] }
 0x1b7   :  { %5757 = vst [vmem:[#allocation10_spill] sm:$0xff] %v4783_v38 }
 0x1b8   :  { %3641 = vtanh.f32 %v849_v49 }
 0x1b9   :  { %v384_v28 = vpop.permute.xlu1 %383 }
 0x1bc   :  { %v4791_v11 = vpop.f32.mrf.mxu2 }
 0x1bd   :  { %v851_v59 = vpop.f32.mrf.mxu0 }
 0x1be   :  { %v4798_v0 = vpop.eup %3641  ;;  %v852_v3 = vadd.f32 %v851_v59, %v359_v2  ;;  %v374_v59 = vpop.permute.xlu2 %373 }
 0x1c0   :  { %3028 = vmatmul.msk.bf16.gmra.mxu0 %vm646_vm1, %v3445_v34  ;;  %3643 = vtanh.f32 %v852_v3  ;;  %v3104_v34 = vor.u32 %v3466_v43, %v3101_v47 }
 0x1c1   :  { %2018 = vmatmul.bf16.gmra.mxu2 %v3056_v63  ;;  %v399_v2 = vpop.permute.xlu1 %398 }
 0x1c4   :  { %v4803_v4 = vpop.f32.mrf.mxu2 }
 0x1c5   :  { %v853_v12 = vpop.f32.mrf.mxu0 }
 0x1c6   :  { %v854_v5 = vadd.f32 %v853_v12, %v4256_v46  ;;  %v4817_v57 = vpop.eup %3643  ;;  %v3072_v46 = vor.u32 %v3458_v45, %v3069_v7  ;;  %v3470_v12 = vld [vmem:[%s5748_s4 + $0xa4] sm:$0xf]  ;;  %v389_v45 = vpop.permute.xlu2 %388 }
 0x1c8   :  { %3645 = vtanh.f32 %v854_v5  ;;  %v3117_v5 = vld [vmem:[%s5748_s4 + $0xb0] sm:$0xf0] }
 0x1c9   :  { %v3120_v27 = vor.u32 %v3470_v12, %v3117_v5  ;;  %v414_v41 = vpop.permute.xlu1 %413  ;;  %v3474_v12 = vld [vmem:[%s5748_s4 + $0xc4] sm:$0xf] }
 0x1cc   :  { %v4812_v23 = vpop.f32.mrf.mxu2 }
 0x1cd   :  { %v4819_v40 = vpop.f32.mrf.mxu0 }
 0x1ce   :  { %v4821_v13 = vpop.eup %3645  ;;  %v404_v43 = vpop.permute.xlu2 %403 }
 0x1cf   :  { %v1095_v31 = vpack.c.bf16 %v4821_v13, %v4817_v57  ;;  %v5769_v57 = vpack.c.bf16 %v4772_v17, %v4770_v62  ;;  %v3043_v13 = vld [vmem:[%s5748_s4 + $0x8] sm:$0xf] }
 0x1d0   :  { %3029 = vmatmul.msk.bf16.gmra.mxu0 %vm646_vm1, %v3446_v20  ;;  %v3449_v20 = vld [vmem:[%s5746_s2 + $0xf8] sm:$0xff] }
 0x1d1   :  { %2023 = vmatmul.bf16.gmra.mxu2 %v3072_v46  ;;  %v4871_v36 = vpop.permute.xlu1 %428 }
 0x1d4   :  { %v4826_v30 = vpop.f32.mrf.mxu2 }
 0x1d5   :  { %v858_v32 = vpop.f32.mrf.mxu0 }
 0x1dc   :  { %v4834_v48 = vpop.f32.mrf.mxu2 }
 0x1dd   :  { %v861_v26 = vpop.f32.mrf.mxu0 }
 0x1de   :  { %v862_v5 = vadd.f32 %v861_v26, %v4270_v56 }
 0x1e0   :  { %3030 = vmatmul.msk.bf16.gmra.mxu0 %vm646_vm1, %v3447_v51 }
 0x1e1   :  { %2028 = vmatmul.bf16.gmra.mxu2 %v3088_v19 }
 0x1e4   :  { %v4840_v37 = vpop.f32.mrf.mxu2 }
 0x1e5   :  { %v863_v21 = vpop.f32.mrf.mxu0 }
 0x1e6   :  { %v864_v1 = vadd.f32 %v863_v21, %v384_v28 }
 0x1ec   :  { %v4848_v49 = vpop.f32.mrf.mxu2 }
 0x1ed   :  { %5758 = vst [vmem:[#allocation11_spill] sm:$0xff] %v4848_v49  ;;  %v866_v54 = vpop.f32.mrf.mxu0 }
 0x1ee   :  { %v867_v10 = vadd.f32 %v866_v54, %v389_v45 }
 0x1f0   :  { %3031 = vmatmul.msk.bf16.gmra.mxu0 %vm646_vm1, %v3448_v52 }
 0x1f1   :  { %2033 = vmatmul.bf16.gmra.mxu2 %v3104_v34 }
 0x1f4   :  { %v4854_v63 = vpop.f32.mrf.mxu2 }
 0x1f5   :  { %5759 = vst [vmem:[#allocation12_spill] sm:$0xff] %v4854_v63  ;;  %v868_v3 = vpop.f32.mrf.mxu0 }
 0x1f6   :  { %v869_v52 = vadd.f32 %v868_v3, %v4284_v6 }
 0x1fc   :  { %v4862_v7 = vpop.f32.mrf.mxu2 }
 0x1fd   :  { %5760 = vst [vmem:[#allocation13_spill] sm:$0xff] %v4862_v7  ;;  %v871_v46 = vpop.f32.mrf.mxu0 }
 0x1fe   :  { %v872_v51 = vadd.f32 %v871_v46, %v399_v2  ;;  %v3133_v2 = vld [vmem:[%s5748_s4 + $0xd0] sm:$0xf0]  ;;  %v859_v46 = vadd.f32 %v858_v32, %v374_v59  ;;  %v419_v59 = vpop.permute.xlu2 %418 }
 0x1ff   :  { %v3136_v45 = vor.u32 %v3474_v12, %v3133_v2  ;;  %v3149_v2 = vld [vmem:[%s5748_s4 + $0xf0] sm:$0xf0] }
 0x200   :  { %3032 = vmatmul.msk.bf16.gmra.mxu0 %vm646_vm1, %v3449_v20  ;;  %3647 = vtanh.f32 %v872_v51 }
 0x201   :  { %2038 = vmatmul.bf16.gmra.mxu2 %v3120_v27  ;;  %v857_v27 = vadd.f32 %v4819_v40, %v369_v16 }
 0x204   :  { %v4868_v19 = vpop.f32.mrf.mxu2 }
 0x205   :  { %5761 = vst [vmem:[#allocation14_spill] sm:$0xff] %v4868_v19  ;;  %v873_v47 = vpop.f32.mrf.mxu0 }
 0x206   :  { %v874_v34 = vadd.f32 %v873_v47, %v404_v43  ;;  %v3648_v3 = vpop.eup %3647  ;;  %v4883_v43 = vpop.permute.xlu1 %478 }
 0x207   :  { %v1885_v47 = vpop.f32.mrf.mxu1 }
 0x208   :  { %3649 = vtanh.f32 %v874_v34 }
 0x209   :  { %3651 = vtanh.f32 %v869_v52 }
 0x20a   :  { %3653 = vtanh.f32 %v867_v10 }
 0x20b   :  { %3655 = vtanh.f32 %v864_v1 }
 0x20c   :  { %v4880_v6 = vpop.f32.mrf.mxu2  ;;  %3657 = vtanh.f32 %v862_v5 }
 0x20d   :  { %5762 = vst [vmem:[#allocation15_spill] sm:$0xff] %v4880_v6  ;;  %v876_v54 = vpop.f32.mrf.mxu0  ;;  %3659 = vtanh.f32 %v859_v46 }
 0x20e   :  { %v3650_v20 = vpop.eup %3649  ;;  %v877_v56 = vadd.f32 %v876_v54, %v4303_v29  ;;  %3661 = vtanh.f32 %v857_v27  ;;  %v3478_v29 = vld [vmem:[%s5748_s4 + $0xe4] sm:$0xf]  ;;  %v4900_v46 = vpop.permute.xlu1 %473 }
 0x20f   :  { %v1099_v21 = vpack.c.bf16 %v3650_v20, %v3648_v3  ;;  %v3652_v28 = vpop.eup %3651 }
 0x210   :  { %v3654_v51 = vpop.eup %3653  ;;  %3663 = vtanh.f32 %v877_v56 }
 0x211   :  { %2043 = vmatmul.bf16.gmra.mxu2 %v3136_v45  ;;  %2134 = vmatpush.bf16.msrb.mxu3 %v1099_v21  ;;  %v1098_v10 = vpack.c.bf16 %v3652_v28, %v3654_v51  ;;  %v3656_v26 = vpop.eup %3655  ;;  %v3152_v45 = vor.u32 %v3478_v29, %v3149_v2  ;;  %v4902_v21 = vpop.f32.mrf.mxu1  ;;  %v5771_v29 = vpack.c.bf16 %v4731_v33, %v4729_v61 }
 0x212   :  { %v3658_v32 = vpop.eup %3657  ;;  %v4904_v28 = vpop.f32.mrf.mxu3 }
 0x213   :  { %v1097_v16 = vpack.c.bf16 %v3656_v26, %v3658_v32  ;;  %v3660_v34 = vpop.eup %3659  ;;  %5765 = vst [vmem:[#allocation18_spill] sm:$0xff] %v4904_v28  ;;  %v434_v51 = vpop.permute.xlu2 %433 }
 0x214   :  { %v4886_v52 = vpop.f32.mrf.mxu2  ;;  %v3662_v12 = vpop.eup %3661 }
 0x215   :  { %5763 = vst [vmem:[#allocation16_spill] sm:$0xff] %v4886_v52  ;;  %v878_v1 = vpop.f32.mrf.mxu0  ;;  %2135 = vmatpush.bf16.msrb.mxu3 %v1098_v10  ;;  %v1096_v5 = vpack.c.bf16 %v3660_v34, %v3662_v12 }
 0x216   :  { %v879_v40 = vadd.f32 %v878_v1, %v414_v41  ;;  %v4896_v54 = vpop.eup %3663  ;;  %v5767_v1 = vpack.c.bf16 %v4798_v0, %v4796_v55  ;;  %v3453_v55 = vld [vmem:[%s5748_s4 + $0x14] sm:$0xf0]  ;;  %v3482_v0 = vld [vmem:[%s5748_s4 + $0x104] sm:$0xf] }
 0x217   :  { %v3044_v17 = vor.u32 %v3453_v55, %v3043_v13 }
 0x218   :  { %3665 = vtanh.f32 %v879_v40  ;;  %v4917_v40 = vpop.permute.xlu1 %448 }
 0x219   :  { %2136 = vmatpush.bf16.msrb.mxu3 %v1097_v16  ;;  %v1890_v16 = vpop.f32.mrf.mxu1 }
 0x21a   :  { %v4919_v34 = vpop.f32.mrf.mxu3 }
 0x21b   :  { %5768 = vst [vmem:[#allocation20_spill] sm:$0xff] %v4919_v34 }
 0x21c   :  { %v4894_v3 = vpop.f32.mrf.mxu2 }
 0x21d   :  { %5764 = vst [vmem:[#allocation17_spill] sm:$0xff] %v4894_v3  ;;  %v881_v41 = vpop.f32.mrf.mxu0  ;;  %2137 = vmatpush.bf16.msrb.mxu3 %v1096_v5 }
 0x21e   :  { %v4898_v20 = vpop.eup %3665  ;;  %v882_v56 = vadd.f32 %v881_v41, %v419_v59 }
 0x220   :  { %3667 = vtanh.f32 %v882_v56 }
 0x221   :  { %2048 = vmatmul.bf16.gmra.mxu2 %v3152_v45  ;;  %2138 = vmatpush.bf16.msrb.mxu3 %v1095_v31  ;;  %v3165_v31 = vld [vmem:[%s5748_s4 + $0x110] sm:$0xf0]  ;;  %v1159_v45 = vpop.permute.xlu1 %1158  ;;  %v4949_v56 = vpop.f32.mrf.mxu1 }
 0x222   :  { %v3168_v2 = vor.u32 %v3482_v0, %v3165_v31  ;;  %v3059_v0 = vld [vmem:[%s5748_s4 + $0x28] sm:$0xf]  ;;  %v3181_v31 = vld [vmem:[%s5748_s4 + $0x130] sm:$0xf0] }
 0x224   :  { %v4911_v10 = vpop.f32.mrf.mxu2 }
 0x225   :  { %5766 = vst [vmem:[#allocation19_spill] sm:$0xff] %v4911_v10  ;;  %v883_v26 = vpop.f32.mrf.mxu0  ;;  %2139 = vmatpush.bf16.msrb.mxu3 %v5767_v1  ;;  %v4951_v1 = vpop.f32.mrf.mxu3 }
 0x226   :  { %v884_v32 = vadd.f32 %v883_v26, %v4328_v50  ;;  %v4930_v50 = vpop.permute.xlu2 %483  ;;  %v4940_v59 = vpop.eup %3667  ;;  %v1886_v26 = vadd.f32 %v1885_v47, %v1159_v45  ;;  %5772 = vst [vmem:[#allocation22_spill] sm:$0xff] %v4951_v1  ;;  %v3457_v47 = vld [vmem:[%s5748_s4 + $0x34] sm:$0xf0] }
 0x228   :  { %3669 = vtanh.f32 %v884_v32 }
 0x229   :  { %2140 = vmatpush.bf16.msrb.mxu3 %v5769_v57 }
 0x22c   :  { %v4938_v62 = vpop.f32.mrf.mxu2 }
 0x22d   :  { %5770 = vst [vmem:[#allocation21_spill] sm:$0xff] %v4938_v62  ;;  %v886_v12 = vpop.f32.mrf.mxu0  ;;  %2141 = vmatpush.bf16.msrb.mxu3 %v5771_v29 }
 0x22e   :  { %v4945_v5 = vpop.eup %3669  ;;  %v887_v32 = vadd.f32 %v886_v12, %v4871_v36  ;;  %v4954_v57 = vpop.permute.xlu2 %458  ;;  %v3486_v36 = vld [vmem:[%s5748_s4 + $0x124] sm:$0xf]  ;;  %v3060_v12 = vor.u32 %v3457_v47, %v3059_v0 }
 0x230   :  { %2142 = vmatmul.bf16.vlgmr.msrb.gmra.mxu3 %v3044_v17  ;;  %3671 = vtanh.f32 %v887_v32  ;;  %v1895_v17 = vpop.f32.mrf.mxu1 }
 0x231   :  { %2053 = vmatmul.bf16.gmra.mxu2 %v3168_v2  ;;  %v4974_v2 = vpop.f32.mrf.mxu3 }
 0x232   :  { %5773 = vst [vmem:[#allocation23_spill] sm:$0xff] %v4974_v2 }
 0x234   :  { %v2014_v61 = vpop.f32.mrf.mxu2 }
 0x235   :  { %v4956_v33 = vadd.f32 %v2014_v61, %v1886_v26  ;;  %v888_v13 = vpop.f32.mrf.mxu0  ;;  %v3184_v26 = vor.u32 %v3486_v36, %v3181_v31 }
 0x236   :  { %v889_v55 = vadd.f32 %v888_v13, %v434_v51  ;;  %v4972_v29 = vpop.eup %3671  ;;  %v4978_v61 = vpop.permute.xlu2 %453 }
 0x238   :  { %3673 = vtanh.f32 %v889_v55  ;;  %v1891_v55 = vadd.f32 %v1890_v16, %v4494_v25  ;;  %v4986_v1 = vpop.f32.mrf.mxu1  ;;  %v3075_v25 = vld [vmem:[%s5748_s4 + $0x48] sm:$0xf]  ;;  %v3490_v16 = vld [vmem:[%s5748_s4 + $0x144] sm:$0xf] }
 0x239   :  { %v4989_v31 = vpop.f32.mrf.mxu3 }
 0x23a   :  { %5774 = vst [vmem:[#allocation24_spill] sm:$0xff] %v4989_v31 }
 0x23c   :  { %v4970_v51 = vpop.f32.mrf.mxu2 }
 0x23d   :  { %v891_v45 = vpop.f32.mrf.mxu0 }
 0x23e   :  { %v4976_v32 = vpop.eup %3673  ;;  %v892_v27 = vadd.f32 %v891_v45, %v4351_v44  ;;  %v4991_v2 = vpop.permute.xlu2 %1163  ;;  %v3461_v44 = vld [vmem:[%s5748_s4 + $0x54] sm:$0xf0] }
 0x240   :  { %2147 = vmatmul.bf16.gmra.mxu3 %v3060_v12  ;;  %3675 = vtanh.f32 %v892_v27 }
 0x241   :  { %2058 = vmatmul.bf16.gmra.mxu2 %v3184_v26  ;;  %v5015_v13 = vpop.f32.mrf.mxu3 }
 0x242   :  { %5775 = vst [vmem:[#allocation25_spill] sm:$0xff] %v5015_v13 }
 0x244   :  { %v2019_v0 = vpop.f32.mrf.mxu2 }
 0x245   :  { %v4984_v47 = vadd.f32 %v2019_v0, %v1891_v55  ;;  %v893_v41 = vpop.f32.mrf.mxu0 }
 0x246   :  { %v894_v36 = vadd.f32 %v893_v41, %v4456_v15  ;;  %v3197_v15 = vld [vmem:[%s5748_s4 + $0x150] sm:$0xf0]  ;;  %v3076_v41 = vor.u32 %v3461_v44, %v3075_v25  ;;  %v5007_v12 = vpop.eup %3675  ;;  %v1179_v31 = vpop.permute.xlu2 %1178 }
 0x247   :  { %v3200_v26 = vor.u32 %v3490_v16, %v3197_v15  ;;  %v1896_v34 = vadd.f32 %v1895_v17, %v1179_v31  ;;  %v5021_v44 = vpop.permute.xlu1 %1173  ;;  %v3091_v16 = vld [vmem:[%s5748_s4 + $0x68] sm:$0xf]  ;;  %v3465_v15 = vld [vmem:[%s5748_s4 + $0x74] sm:$0xf0]  ;;  %v3494_v17 = vld [vmem:[%s5748_s4 + $0x164] sm:$0xf] }
 0x248   :  { %3677 = vtanh.f32 %v894_v36  ;;  %v1900_v36 = vpop.f32.mrf.mxu1 }
 0x24c   :  { %v5005_v27 = vpop.f32.mrf.mxu2 }
 0x24d   :  { %v5009_v45 = vpop.f32.mrf.mxu0 }
 0x24e   :  { %v5011_v55 = vpop.eup %3677  ;;  %v5066_v7 = vpop.permute.xlu2 %1193 }
 0x24f   :  { %v1189_v62 = vpop.permute.xlu1 %1188 }
 0x250   :  { %2152 = vmatmul.bf16.gmra.mxu3 %v3076_v41  ;;  %v5029_v41 = vpop.f32.mrf.mxu1  ;;  %v1901_v10 = vadd.f32 %v1900_v36, %v1189_v62  ;;  %v3229_v62 = vld [vmem:[%s5748_s4 + $0x190] sm:$0xf0] }
 0x251   :  { %2063 = vmatmul.bf16.gmra.mxu2 %v3200_v26  ;;  %5776 = vst [vmem:[#allocation26_spill] sm:$0xff] %v5029_v41  ;;  %v3092_v26 = vor.u32 %v3465_v15, %v3091_v16  ;;  %v3469_v16 = vld [vmem:[%s5748_s4 + $0x94] sm:$0xf0] }
 0x254   :  { %v2024_v28 = vpop.f32.mrf.mxu2 }
 0x255   :  { %v5017_v38 = vadd.f32 %v2024_v28, %v1896_v34  ;;  %v5019_v25 = vpop.f32.mrf.mxu0  ;;  %v3213_v28 = vld [vmem:[%s5748_s4 + $0x170] sm:$0xf0]  ;;  %v5037_v34 = vpop.f32.mrf.mxu3 }
 0x256   :  { %5777 = vst [vmem:[#allocation27_spill] sm:$0xff] %v5037_v34  ;;  %v3216_v13 = vor.u32 %v3494_v17, %v3213_v28  ;;  %v3107_v34 = vld [vmem:[%s5748_s4 + $0x88] sm:$0xf] }
 0x258   :  { %v1905_v3 = vpop.f32.mrf.mxu1 }
 0x25c   :  { %v5039_v31 = vpop.f32.mrf.mxu2 }
 0x25d   :  { %v901_v0 = vpop.f32.mrf.mxu0  ;;  %v5041_v52 = vpop.f32.mrf.mxu3 }
 0x25e   :  { %5778 = vst [vmem:[#allocation28_spill] sm:$0xff] %v5041_v52 }
 0x260   :  { %2157 = vmatmul.bf16.gmra.mxu3 %v3092_v26  ;;  %v5059_v17 = vpop.f32.mrf.mxu1  ;;  %v1906_v26 = vadd.f32 %v1905_v3, %v4545_v60  ;;  %v3502_v60 = vld [vmem:[%s5748_s4 + $0x1a4] sm:$0xf] }
 0x261   :  { %2068 = vmatmul.bf16.gmra.mxu2 %v3216_v13  ;;  %v3498_v13 = vld [vmem:[%s5748_s4 + $0x184] sm:$0xf]  ;;  %5780 = vst [vmem:[#allocation30_spill] sm:$0xff] %v5059_v17 }
 0x262   :  { %v3232_v15 = vor.u32 %v3498_v13, %v3229_v62 }
 0x264   :  { %v2029_v14 = vpop.f32.mrf.mxu2 }
 0x265   :  { %v5043_v6 = vadd.f32 %v2029_v14, %v1901_v10  ;;  %v903_v24 = vpop.f32.mrf.mxu0  ;;  %v3108_v14 = vor.u32 %v3469_v16, %v3107_v34  ;;  %v5061_v28 = vpop.f32.mrf.mxu3  ;;  %v3123_v34 = vld [vmem:[%s5748_s4 + $0xa8] sm:$0xf]  ;;  %v3473_v16 = vld [vmem:[%s5748_s4 + $0xb4] sm:$0xf0] }
 0x266   :  { %5781 = vst [vmem:[#allocation31_spill] sm:$0xff] %v5061_v28  ;;  %v3124_v13 = vor.u32 %v3473_v16, %v3123_v34  ;;  %v5093_v16 = vpop.permute.xlu1 %1203 }
 0x268   :  { %v1910_v63 = vpop.f32.mrf.mxu1 }
 0x26c   :  { %v5057_v36 = vpop.f32.mrf.mxu2 }
 0x26d   :  { %5779 = vst [vmem:[#allocation29_spill] sm:$0xff] %v5057_v36  ;;  %v906_v10 = vpop.f32.mrf.mxu0  ;;  %v5068_v49 = vpop.f32.mrf.mxu3 }
 0x26e   :  { %5783 = vst [vmem:[#allocation33_spill] sm:$0xff] %v5068_v49 }
 0x270   :  { %2162 = vmatmul.bf16.gmra.mxu3 %v3108_v14 }
 0x271   :  { %2073 = vmatmul.bf16.gmra.mxu2 %v3232_v15  ;;  %v1209_v15 = vpop.permute.xlu2 %1208 }
 0x272   :  { %v1911_v49 = vadd.f32 %v1910_v63, %v1209_v15  ;;  %v3139_v63 = vld [vmem:[%s5748_s4 + $0xc8] sm:$0xf] }
 0x274   :  { %v2034_v52 = vpop.f32.mrf.mxu2 }
 0x275   :  { %v5064_v19 = vadd.f32 %v2034_v52, %v1906_v26  ;;  %v908_v9 = vpop.f32.mrf.mxu0  ;;  %v3245_v52 = vld [vmem:[%s5748_s4 + $0x1b0] sm:$0xf0]  ;;  %v5084_v26 = vpop.f32.mrf.mxu1 }
 0x276   :  { %v3248_v14 = vor.u32 %v3502_v60, %v3245_v52  ;;  %v5086_v28 = vpop.f32.mrf.mxu3  ;;  %v909_v41 = vadd.f32 %v908_v9, %v4900_v46  ;;  %v907_v60 = vadd.f32 %v906_v10, %v4396_v18  ;;  %v3506_v9 = vld [vmem:[%s5748_s4 + $0x1c4] sm:$0xf]  ;;  %v3261_v18 = vld [vmem:[%s5748_s4 + $0x1d0] sm:$0xf0]  ;;  %v902_v46 = vadd.f32 %v901_v0, %v4954_v57  ;;  %v1219_v0 = vpop.permute.xlu1 %1218 }
 0x277   :  { %5782 = vst [vmem:[#allocation32_spill] sm:$0xff] %v5064_v19 }
 0x27c   :  { %v5082_v3 = vpop.f32.mrf.mxu2 }
 0x27d   :  { %v911_v62 = vpop.f32.mrf.mxu0 }
 0x27e   :  { %v912_v17 = vadd.f32 %v911_v62, %v4883_v43  ;;  %v1915_v43 = vpop.f32.mrf.mxu1  ;;  %v897_v62 = vadd.f32 %v5009_v45, %v4917_v40 }
 0x280   :  { %2167 = vmatmul.bf16.gmra.mxu3 %v3124_v13  ;;  %3679 = vtanh.f32 %v912_v17  ;;  %v5112_v17 = vpop.f32.mrf.mxu3 }
 0x281   :  { %2078 = vmatmul.bf16.gmra.mxu2 %v3248_v14  ;;  %5784 = vst [vmem:[#allocation34_spill] sm:$0xff] %v5112_v17  ;;  %v1916_v14 = vadd.f32 %v1915_v43, %v1219_v0  ;;  %v3510_v43 = vld [vmem:[%s5748_s4 + $0x1e4] sm:$0xf] }
 0x284   :  { %v2039_v19 = vpop.f32.mrf.mxu2 }
 0x285   :  { %v5089_v22 = vadd.f32 %v2039_v19, %v1911_v49  ;;  %v913_v36 = vpop.f32.mrf.mxu0  ;;  %v3477_v49 = vld [vmem:[%s5748_s4 + $0xd4] sm:$0xf0]  ;;  %v904_v19 = vadd.f32 %v903_v24, %v4426_v35  ;;  %v3264_v35 = vor.u32 %v3506_v9, %v3261_v18 }
 0x286   :  { %v914_v34 = vadd.f32 %v913_v36, %v4930_v50  ;;  %v3140_v36 = vor.u32 %v3477_v49, %v3139_v63  ;;  %v3680_v10 = vpop.eup %3679  ;;  %v3481_v9 = vld [vmem:[%s5748_s4 + $0xf4] sm:$0xf0] }
 0x288   :  { %3681 = vtanh.f32 %v914_v34  ;;  %v5122_v49 = vpop.f32.mrf.mxu3 }
 0x289   :  { %3683 = vtanh.f32 %v909_v41  ;;  %v899_v41 = vadd.f32 %v5019_v25, %v4978_v61  ;;  %v5120_v25 = vpop.f32.mrf.mxu1  ;;  %5785 = vst [vmem:[#allocation35_spill] sm:$0xff] %v5122_v49 }
 0x28a   :  { %3685 = vtanh.f32 %v907_v60 }
 0x28b   :  { %3687 = vtanh.f32 %v904_v19  ;;  %v3155_v19 = vld [vmem:[%s5748_s4 + $0xe8] sm:$0xf] }
 0x28c   :  { %v5110_v50 = vpop.f32.mrf.mxu2  ;;  %3689 = vtanh.f32 %v902_v46  ;;  %v3277_v46 = vld [vmem:[%s5748_s4 + $0x1f0] sm:$0xf0] }
 0x28d   :  { %3691 = vtanh.f32 %v899_v41 }
 0x28e   :  { %v3682_v24 = vpop.eup %3681  ;;  %3693 = vtanh.f32 %v897_v62 }
 0x28f   :  { %v1107_v52 = vpack.c.bf16 %v3682_v24, %v3680_v10  ;;  %v3684_v13 = vpop.eup %3683  ;;  %v3280_v24 = vor.u32 %v3510_v43, %v3277_v46 }
 0x290   :  { %2172 = vmatmul.bf16.gmra.mxu3 %v3140_v36  ;;  %v3686_v57 = vpop.eup %3685 }
 0x291   :  { %2083 = vmatmul.bf16.gmra.mxu2 %v3264_v35  ;;  %2263 = vmatpush.bf16.msrb.mxu1 %v1107_v52  ;;  %v1106_v15 = vpack.c.bf16 %v3684_v13, %v3686_v57  ;;  %v3688_v34 = vpop.eup %3687  ;;  %v3156_v35 = vor.u32 %v3481_v9, %v3155_v19  ;;  %v1920_v41 = vpop.f32.mrf.mxu1  ;;  %v5787_v13 = vpack.c.bf16 %v5011_v55, %v5007_v12  ;;  %v3451_v12 = vld [vmem:[%s5748_s4 + $0xc] sm:$0xf] }
 0x292   :  { %v3690_v61 = vpop.eup %3689  ;;  %v5138_v52 = vpop.f32.mrf.mxu3  ;;  %v1921_v62 = vadd.f32 %v1920_v41, %v4602_v39  ;;  %v3485_v39 = vld [vmem:[%s5748_s4 + $0x114] sm:$0xf0]  ;;  %v3061_v41 = vld [vmem:[%s5748_s4 + $0x38] sm:$0xf0] }
 0x293   :  { %v1105_v40 = vpack.c.bf16 %v3688_v34, %v3690_v61  ;;  %v3692_v45 = vpop.eup %3691  ;;  %5786 = vst [vmem:[#allocation36_spill] sm:$0xff] %v5138_v52  ;;  %v3171_v34 = vld [vmem:[%s5748_s4 + $0x108] sm:$0xf] }
 0x294   :  { %v2044_v60 = vpop.f32.mrf.mxu2  ;;  %v3694_v18 = vpop.eup %3693  ;;  %v3172_v61 = vor.u32 %v3485_v39, %v3171_v34 }
 0x295   :  { %v5118_v63 = vadd.f32 %v2044_v60, %v1916_v14  ;;  %2264 = vmatpush.bf16.msrb.mxu1 %v1106_v15  ;;  %v1104_v36 = vpack.c.bf16 %v3692_v45, %v3694_v18  ;;  %v5788_v14 = vpack.c.bf16 %v4976_v32, %v4972_v29  ;;  %v5149_v15 = vpop.permute.xlu2 %1223  ;;  %v5789_v60 = vpack.c.bf16 %v4945_v5, %v4940_v59  ;;  %v3045_v29 = vld [vmem:[%s5748_s4 + $0x18] sm:$0xf0]  ;;  %v3514_v32 = vld [vmem:[%s5748_s4 + $0x204] sm:$0xf]  ;;  %v3293_v59 = vld [vmem:[%s5748_s4 + $0x210] sm:$0xf0] }
 0x296   :  { %v5791_v45 = vpack.c.bf16 %v4898_v20, %v4896_v54  ;;  %v3296_v19 = vor.u32 %v3514_v32, %v3293_v59  ;;  %v1888_v54 = vadd.f32 %v4902_v21, %v4991_v2  ;;  %v3187_v20 = vld [vmem:[%s5748_s4 + $0x128] sm:$0xf]  ;;  %v3518_v21 = vld [vmem:[%s5748_s4 + $0x224] sm:$0xf]  ;;  %v3309_v2 = vld [vmem:[%s5748_s4 + $0x230] sm:$0xf0] }
 0x299   :  { %2265 = vmatpush.bf16.msrb.mxu1 %v1105_v40  ;;  %v3048_v40 = vor.u32 %v3451_v12, %v3045_v29 }
 0x29a   :  { %v5172_v5 = vpop.f32.mrf.mxu3 }
 0x29b   :  { %5790 = vst [vmem:[#allocation37_spill] sm:$0xff] %v5172_v5 }
 0x29c   :  { %v5136_v10 = vpop.f32.mrf.mxu2 }
 0x29d   :  { %2266 = vmatpush.bf16.msrb.mxu1 %v1104_v36  ;;  %v1239_v9 = vpop.permute.xlu2 %1238 }
 0x29e   :  { %v1926_v18 = vadd.f32 %v4781_v42, %v1239_v9  ;;  %v3489_v42 = vld [vmem:[%s5748_s4 + $0x134] sm:$0xf0] }
 0x2a0   :  { %2177 = vmatmul.bf16.gmra.mxu3 %v3156_v35 }
 0x2a1   :  { %2088 = vmatmul.bf16.gmra.mxu2 %v3280_v24  ;;  %2267 = vmatpush.bf16.msrb.mxu1 %v5787_v13  ;;  %v5185_v24 = vpop.permute.xlu1 %1233  ;;  %v2017_v13 = vadd.f32 %v4970_v51, %v1888_v54  ;;  %v3312_v51 = vor.u32 %v3518_v21, %v3309_v2 }
 0x2a4   :  { %v2049_v57 = vpop.f32.mrf.mxu2 }
 0x2a5   :  { %v5144_v0 = vadd.f32 %v2049_v57, %v1921_v62  ;;  %2268 = vmatpush.bf16.msrb.mxu1 %v5788_v14  ;;  %v1928_v62 = vadd.f32 %v4791_v11, %v4635_v8  ;;  %v1893_v11 = vadd.f32 %v4949_v56, %v5021_v44  ;;  %v1254_v9 = vpop.permute.xlu2 %1253  ;;  %v3522_v56 = vld [vmem:[%s5748_s4 + $0x244] sm:$0xf]  ;;  %v3325_v44 = vld [vmem:[%s5748_s4 + $0x250] sm:$0xf0] }
 0x2a9   :  { %2269 = vmatpush.bf16.msrb.mxu1 %v5789_v60  ;;  %v3188_v60 = vor.u32 %v3489_v42, %v3187_v20  ;;  %v1249_v29 = vpop.permute.xlu1 %1248 }
 0x2aa   :  { %v1931_v32 = vadd.f32 %v4803_v4, %v1249_v29  ;;  %v3459_v4 = vld [vmem:[%s5748_s4 + $0x4c] sm:$0xf] }
 0x2ac   :  { %v5174_v55 = vpop.f32.mrf.mxu2 }
 0x2ad   :  { %2270 = vmatpush.bf16.msrb.mxu1 %v5791_v45  ;;  %v3203_v45 = vld [vmem:[%s5748_s4 + $0x148] sm:$0xf] }
 0x2b0   :  { %2182 = vmatmul.bf16.gmra.mxu3 %v3172_v61  ;;  %2271 = vmatmul.bf16.vlgmr.msrb.gmra.mxu1 %v3048_v40 }
 0x2b1   :  { %2093 = vmatmul.bf16.gmra.mxu2 %v3296_v19  ;;  %v3493_v19 = vld [vmem:[%s5748_s4 + $0x154] sm:$0xf0] }
 0x2b2   :  { %v3204_v42 = vor.u32 %v3493_v19, %v3203_v45 }
 0x2b3   :  { %v2143_v43 = vpop.f32.mrf.mxu3 }
 0x2b4   :  { %v2054_v46 = vpop.f32.mrf.mxu2  ;;  %v5181_v36 = vadd.f32 %v2143_v43, %v4956_v33  ;;  %v3455_v33 = vld [vmem:[%s5748_s4 + $0x2c] sm:$0xf]  ;;  %v1933_v43 = vadd.f32 %v4812_v23, %v1254_v9 }
 0x2b5   :  { %v5183_v35 = vadd.f32 %v2054_v46, %v1926_v18  ;;  %v3064_v39 = vor.u32 %v3455_v33, %v3061_v41  ;;  %v2022_v18 = vadd.f32 %v5005_v27, %v1893_v11  ;;  %v1936_v27 = vadd.f32 %v4826_v30, %v4665_v58  ;;  %v3463_v58 = vld [vmem:[%s5748_s4 + $0x6c] sm:$0xf]  ;;  %v1264_v30 = vpop.permute.xlu1 %1263 }
 0x2bb   :  { %v2145_v57 = vpop.f32.mrf.mxu3 }
 0x2bc   :  { %v2056_v14 = vpop.f32.mrf.mxu2  ;;  %v5210_v34 = vadd.f32 %v2145_v57, %v2017_v13  ;;  %v3328_v13 = vor.u32 %v3522_v56, %v3325_v44  ;;  %v1898_v57 = vadd.f32 %v4986_v1, %v4510_v53  ;;  %v3526_v53 = vld [vmem:[%s5748_s4 + $0x264] sm:$0xf]  ;;  %v3341_v1 = vld [vmem:[%s5748_s4 + $0x270] sm:$0xf0] }
 0x2bd   :  { %v5212_v12 = vadd.f32 %v2056_v14, %v1928_v62  ;;  %v3219_v14 = vld [vmem:[%s5748_s4 + $0x168] sm:$0xf]  ;;  %v3344_v19 = vor.u32 %v3526_v53, %v3341_v1  ;;  %v1279_v53 = vpop.permute.xlu1 %1278  ;;  %v5796_v1 = vld [vmem:[#allocation12_spill] sm:$0xff] }
 0x2be   :  { %v5792_v56 = vld [vmem:[#allocation26_spill] sm:$0xff] }
 0x2bf   :  { %v1903_v44 = vadd.f32 %v5792_v56, %v5066_v7  ;;  %v3530_v7 = vld [vmem:[%s5748_s4 + $0x284] sm:$0xf]  ;;  %v3251_v56 = vld [vmem:[%s5748_s4 + $0x1a8] sm:$0xf] }
 0x2c0   :  { %2187 = vmatmul.bf16.gmra.mxu3 %v3188_v60  ;;  %2276 = vmatmul.bf16.gmra.mxu1 %v3064_v39  ;;  %v3497_v60 = vld [vmem:[%s5748_s4 + $0x174] sm:$0xf0]  ;;  %v2027_v39 = vadd.f32 %v5039_v31, %v1898_v57  ;;  %v1269_v31 = vpop.permute.xlu2 %1268 }
 0x2c1   :  { %2098 = vmatmul.bf16.gmra.mxu2 %v3312_v51  ;;  %v1938_v51 = vadd.f32 %v4834_v48, %v1264_v30 }
 0x2c3   :  { %v2148_v59 = vpop.f32.mrf.mxu3 }
 0x2c4   :  { %v2059_v61 = vpop.f32.mrf.mxu2  ;;  %v5216_v40 = vadd.f32 %v2148_v59, %v4984_v47  ;;  %v3077_v47 = vld [vmem:[%s5748_s4 + $0x58] sm:$0xf0] }
 0x2c5   :  { %v5218_v8 = vadd.f32 %v2059_v61, %v1931_v32  ;;  %v3080_v33 = vor.u32 %v3459_v4, %v3077_v47  ;;  %v3220_v61 = vor.u32 %v3497_v60, %v3219_v14  ;;  %v1941_v4 = vadd.f32 %v4840_v37, %v1269_v31  ;;  %v3467_v37 = vld [vmem:[%s5748_s4 + $0x8c] sm:$0xf] }
 0x2cb   :  { %v2150_v46 = vpop.f32.mrf.mxu3 }
 0x2cc   :  { %v2061_v54 = vpop.f32.mrf.mxu2  ;;  %v5242_v20 = vadd.f32 %v2150_v46, %v2022_v18  ;;  %v3501_v46 = vld [vmem:[%s5748_s4 + $0x194] sm:$0xf0] }
 0x2cd   :  { %v5244_v41 = vadd.f32 %v2061_v54, %v1933_v43  ;;  %v3235_v43 = vld [vmem:[%s5748_s4 + $0x188] sm:$0xf]  ;;  %v5793_v54 = vld [vmem:[#allocation29_spill] sm:$0xff] }
 0x2ce   :  { %v3236_v60 = vor.u32 %v3501_v46, %v3235_v43  ;;  %v3471_v43 = vld [vmem:[%s5748_s4 + $0xac] sm:$0xf]  ;;  %v3125_v46 = vld [vmem:[%s5748_s4 + $0xb8] sm:$0xf0] }
 0x2d0   :  { %2192 = vmatmul.bf16.gmra.mxu3 %v3204_v42  ;;  %2281 = vmatmul.bf16.gmra.mxu1 %v3080_v33  ;;  %v2032_v42 = vadd.f32 %v5793_v54, %v1903_v44  ;;  %v3357_v33 = vld [vmem:[%s5748_s4 + $0x290] sm:$0xf0]  ;;  %v3505_v44 = vld [vmem:[%s5748_s4 + $0x1b4] sm:$0xf0] }
 0x2d1   :  { %2103 = vmatmul.bf16.gmra.mxu2 %v3328_v13  ;;  %v5794_v13 = vld [vmem:[#allocation7_spill] sm:$0xff]  ;;  %v5799_v54 = vld [vmem:[#allocation13_spill] sm:$0xff] }
 0x2d3   :  { %v2153_v21 = vpop.f32.mrf.mxu3 }
 0x2d4   :  { %v2064_v2 = vpop.f32.mrf.mxu2  ;;  %v5249_v62 = vadd.f32 %v2153_v21, %v5017_v38  ;;  %v3093_v38 = vld [vmem:[%s5748_s4 + $0x78] sm:$0xf0] }
 0x2d5   :  { %v5251_v23 = vadd.f32 %v2064_v2, %v1936_v27  ;;  %v3096_v11 = vor.u32 %v3463_v58, %v3093_v38  ;;  %v5795_v27 = vld [vmem:[#allocation11_spill] sm:$0xff]  ;;  %v1284_v38 = vpop.permute.xlu2 %1283 }
 0x2d6   :  { %v1943_v21 = vadd.f32 %v5795_v27, %v5794_v13  ;;  %v3252_v27 = vor.u32 %v3505_v44, %v3251_v56  ;;  %v3475_v56 = vld [vmem:[%s5748_s4 + $0xcc] sm:$0xf] }
 0x2db   :  { %v2155_v29 = vpop.f32.mrf.mxu3 }
 0x2dc   :  { %v2066_v32 = vpop.f32.mrf.mxu2  ;;  %v5275_v59 = vadd.f32 %v2155_v29, %v2027_v39  ;;  %v3360_v39 = vor.u32 %v3530_v7, %v3357_v33 }
 0x2dd   :  { %v5277_v45 = vadd.f32 %v2066_v32, %v1938_v51  ;;  %v1946_v51 = vadd.f32 %v5796_v1, %v1279_v53  ;;  %v1299_v31 = vpop.permute.xlu2 %1298 }
 0x2e0   :  { %2197 = vmatmul.bf16.gmra.mxu3 %v3220_v61  ;;  %2286 = vmatmul.bf16.gmra.mxu1 %v3096_v11  ;;  %v5797_v61 = vld [vmem:[#allocation32_spill] sm:$0xff] }
 0x2e1   :  { %2108 = vmatmul.bf16.gmra.mxu2 %v3344_v19 }
 0x2e3   :  { %v2158_v47 = vpop.f32.mrf.mxu3 }
 0x2e4   :  { %v2069_v9 = vpop.f32.mrf.mxu2  ;;  %v5281_v18 = vadd.f32 %v2158_v47, %v5043_v6  ;;  %v3109_v6 = vld [vmem:[%s5748_s4 + $0x98] sm:$0xf0]  ;;  %v5798_v47 = vld [vmem:[#allocation30_spill] sm:$0xff] }
 0x2e5   :  { %v5283_v48 = vadd.f32 %v2069_v9, %v1941_v4  ;;  %v3112_v58 = vor.u32 %v3467_v37, %v3109_v6  ;;  %v1294_v4 = vpop.permute.xlu1 %1293  ;;  %v1908_v9 = vadd.f32 %v5798_v47, %v5093_v16  ;;  %v3534_v16 = vld [vmem:[%s5748_s4 + $0x2a4] sm:$0xf]  ;;  %v3373_v6 = vld [vmem:[%s5748_s4 + $0x2b0] sm:$0xf0]  ;;  %v3267_v47 = vld [vmem:[%s5748_s4 + $0x1c8] sm:$0xf] }
 0x2e7   :  { %v2037_v37 = vadd.f32 %v5082_v3, %v1908_v9  ;;  %v5344_v3 = vpop.permute.xlu2 %1313  ;;  %v3509_v9 = vld [vmem:[%s5748_s4 + $0x1d4] sm:$0xf0] }
 0x2eb   :  { %v2160_v2 = vpop.f32.mrf.mxu3 }
 0x2ec   :  { %v2071_v57 = vpop.f32.mrf.mxu2  ;;  %v5308_v14 = vadd.f32 %v2160_v2, %v2032_v42  ;;  %v1948_v42 = vadd.f32 %v5799_v54, %v1284_v38 }
 0x2ed   :  { %v5310_v30 = vadd.f32 %v2071_v57, %v1943_v21  ;;  %v3128_v21 = vor.u32 %v3471_v43, %v3125_v46  ;;  %v3376_v57 = vor.u32 %v3534_v16, %v3373_v6  ;;  %v3389_v43 = vld [vmem:[%s5748_s4 + $0x2d0] sm:$0xf0] }
 0x2ef   :  { %v5374_v46 = vpop.permute.xlu2 %1328 }
 0x2f0   :  { %2202 = vmatmul.bf16.gmra.mxu3 %v3236_v60  ;;  %2291 = vmatmul.bf16.gmra.mxu1 %v3112_v58  ;;  %v1309_v60 = vpop.permute.xlu1 %1308  ;;  %v5800_v58 = vld [vmem:[#allocation8_spill] sm:$0xff] }
 0x2f1   :  { %2113 = vmatmul.bf16.gmra.mxu2 %v3360_v39  ;;  %v5801_v39 = vld [vmem:[#allocation14_spill] sm:$0xff] }
 0x2f2   :  { %v1951_v53 = vadd.f32 %v5801_v39, %v5800_v58 }
 0x2f3   :  { %v2163_v29 = vpop.f32.mrf.mxu3 }
 0x2f4   :  { %v2074_v32 = vpop.f32.mrf.mxu2  ;;  %v5314_v11 = vadd.f32 %v2163_v29, %v5797_v61 }
 0x2f5   :  { %v5316_v19 = vadd.f32 %v2074_v32, %v1946_v51  ;;  %v5802_v32 = vld [vmem:[#allocation6_spill] sm:$0xff] }
 0x2f6   :  { %v1913_v61 = vadd.f32 %v5084_v26, %v5802_v32  ;;  %v3538_v26 = vld [vmem:[%s5748_s4 + $0x2c4] sm:$0xf] }
 0x2f8   :  { %v2042_v44 = vadd.f32 %v5110_v50, %v1913_v61  ;;  %v5377_v54 = vpop.permute.xlu1 %1323 }
 0x2fb   :  { %v2165_v7 = vpop.f32.mrf.mxu3 }
 0x2fc   :  { %v2076_v33 = vpop.f32.mrf.mxu2  ;;  %v5340_v13 = vadd.f32 %v2165_v7, %v2037_v37  ;;  %v5803_v37 = vld [vmem:[#allocation15_spill] sm:$0xff] }
 0x2fd   :  { %v5342_v2 = vadd.f32 %v2076_v33, %v1948_v42  ;;  %v1953_v16 = vadd.f32 %v5803_v37, %v1294_v4  ;;  %v3268_v33 = vor.u32 %v3509_v9, %v3267_v47  ;;  %v1918_v47 = vadd.f32 %v5120_v25, %v5149_v15  ;;  %v3513_v9 = vld [vmem:[%s5748_s4 + $0x1f4] sm:$0xf0]  ;;  %v3542_v25 = vld [vmem:[%s5748_s4 + $0x2e4] sm:$0xf]  ;;  %v3405_v15 = vld [vmem:[%s5748_s4 + $0x2f0] sm:$0xf0] }
 0x300   :  { %2207 = vmatmul.bf16.gmra.mxu3 %v3252_v27  ;;  %2296 = vmatmul.bf16.gmra.mxu1 %v3128_v21  ;;  %v3392_v21 = vor.u32 %v3538_v26, %v3389_v43  ;;  %v5393_v61 = vpop.permute.xlu1 %1338  ;;  %v5806_v26 = vld [vmem:[#allocation17_spill] sm:$0xff] }
 0x301   :  { %2118 = vmatmul.bf16.gmra.mxu2 %v3376_v57  ;;  %v5804_v57 = vld [vmem:[#allocation16_spill] sm:$0xff] }
 0x302   :  { %v1956_v58 = vadd.f32 %v5804_v57, %v1299_v31  ;;  %v3283_v31 = vld [vmem:[%s5748_s4 + $0x1e8] sm:$0xf] }
 0x303   :  { %v2168_v1 = vpop.f32.mrf.mxu3 }
 0x304   :  { %v2079_v38 = vpop.f32.mrf.mxu2  ;;  %v5349_v51 = vadd.f32 %v2168_v1, %v5089_v22  ;;  %v3141_v22 = vld [vmem:[%s5748_s4 + $0xd8] sm:$0xf0] }
 0x305   :  { %v5351_v29 = vadd.f32 %v2079_v38, %v1951_v53  ;;  %v3144_v50 = vor.u32 %v3475_v56, %v3141_v22  ;;  %v5384_v53 = vpop.permute.xlu0 %1333  ;;  %v5389_v38 = vpop.permute.xlu2 %1343  ;;  %v3157_v56 = vld [vmem:[%s5748_s4 + $0xf8] sm:$0xf0]  ;;  %v2047_v22 = vadd.f32 %v5136_v10, %v1918_v47  ;;  %v3408_v10 = vor.u32 %v3542_v25, %v3405_v15  ;;  %v3299_v25 = vld [vmem:[%s5748_s4 + $0x208] sm:$0xf] }
 0x30b   :  { %v2170_v6 = vpop.f32.mrf.mxu3 }
 0x30c   :  { %v2081_v42 = vpop.f32.mrf.mxu2  ;;  %v5379_v7 = vadd.f32 %v2170_v6, %v2042_v44  ;;  %v5805_v44 = vld [vmem:[#allocation9_spill] sm:$0xff] }
 0x30d   :  { %v5381_v27 = vadd.f32 %v2081_v42, %v1953_v16  ;;  %v1958_v43 = vadd.f32 %v5806_v26, %v5805_v44  ;;  %v3284_v42 = vor.u32 %v3513_v9, %v3283_v31  ;;  %v5424_v57 = vpop.permute.xlu2 %1358  ;;  %v1922_v31 = vpop.f32.mrf.mxu1  ;;  %v3173_v26 = vld [vmem:[%s5748_s4 + $0x118] sm:$0xf0] }
 0x310   :  { %2212 = vmatmul.bf16.gmra.mxu3 %v3268_v33  ;;  %2301 = vmatmul.bf16.gmra.mxu1 %v3144_v50 }
 0x311   :  { %2123 = vmatmul.bf16.gmra.mxu2 %v3392_v21  ;;  %v5422_v21 = vpop.permute.xlu0 %1348 }
 0x313   :  { %v2173_v39 = vpop.f32.mrf.mxu3 }
 0x314   :  { %v2084_v4 = vpop.f32.mrf.mxu2  ;;  %v5387_v1 = vadd.f32 %v2173_v39, %v5118_v63  ;;  %v3479_v63 = vld [vmem:[%s5748_s4 + $0xec] sm:$0xf] }
 0x315   :  { %v5391_v32 = vadd.f32 %v2084_v4, %v1956_v58  ;;  %v3160_v33 = vor.u32 %v3479_v63, %v3157_v56  ;;  %v5426_v58 = vpop.permute.xlu1 %1353  ;;  %v5807_v39 = vld [vmem:[#allocation19_spill] sm:$0xff]  ;;  %v1923_v56 = vadd.f32 %v1922_v31, %v5185_v24  ;;  %v5440_v15 = vpop.permute.xlu2 %1373 }
 0x316   :  { %v1961_v4 = vadd.f32 %v5807_v39, %v1309_v60  ;;  %v3517_v60 = vld [vmem:[%s5748_s4 + $0x214] sm:$0xf0] }
 0x317   :  { %v2052_v24 = vadd.f32 %v5174_v55, %v1923_v56  ;;  %v3300_v39 = vor.u32 %v3517_v60, %v3299_v25  ;;  %v5811_v25 = vld [vmem:[#allocation10_spill] sm:$0xff] }
 0x319   :  { %v5434_v63 = vpop.permute.xlu0 %1363 }
 0x31b   :  { %v2175_v37 = vpop.f32.mrf.mxu3 }
 0x31c   :  { %v2086_v16 = vpop.f32.mrf.mxu2  ;;  %v5418_v6 = vadd.f32 %v2175_v37, %v2047_v22  ;;  %v5808_v37 = vld [vmem:[#allocation21_spill] sm:$0xff] }
 0x31d   :  { %v5420_v50 = vadd.f32 %v2086_v16, %v1958_v43  ;;  %v5451_v43 = vpop.permute.xlu1 %1368  ;;  %v1963_v16 = vadd.f32 %v5808_v37, %v5344_v3  ;;  %v5463_v52 = vpop.permute.xlu2 %1388  ;;  %v3521_v37 = vld [vmem:[%s5748_s4 + $0x234] sm:$0xf0] }
 0x31e   :  { %5809 = vst [vmem:[#allocation26_spill] sm:$0xff] %v5463_v52 }
 0x320   :  { %2217 = vmatmul.bf16.gmra.mxu3 %v3284_v42  ;;  %2306 = vmatmul.bf16.gmra.mxu1 %v3160_v33 }
 0x321   :  { %2128 = vmatmul.bf16.gmra.mxu2 %v3408_v10  ;;  %v5461_v5 = vpop.permute.xlu0 %1378 }
 0x323   :  { %v2178_v47 = vpop.f32.mrf.mxu3 }
 0x324   :  { %v2089_v44 = vpop.f32.mrf.mxu2  ;;  %v5430_v22 = vadd.f32 %v2178_v47, %v5144_v0  ;;  %v3483_v0 = vld [vmem:[%s5748_s4 + $0x10c] sm:$0xf] }
 0x325   :  { %v5432_v9 = vadd.f32 %v2089_v44, %v1961_v4  ;;  %v3176_v4 = vor.u32 %v3483_v0, %v3173_v26  ;;  %v5465_v56 = vpop.permute.xlu1 %1383  ;;  %v3315_v26 = vld [vmem:[%s5748_s4 + $0x228] sm:$0xf]  ;;  %v2496_v52 = vpop.permute.xlu2 %2495 }
 0x326   :  { %5810 = vst [vmem:[#allocation29_spill] sm:$0xff] %v5465_v56 }
 0x32b   :  { %v2180_v42 = vpop.f32.mrf.mxu3 }
 0x32c   :  { %v2091_v33 = vpop.f32.mrf.mxu2  ;;  %v5456_v10 = vadd.f32 %v2180_v42, %v2052_v24  ;;  %v5812_v42 = vld [vmem:[#allocation18_spill] sm:$0xff] }
 0x32d   :  { %v5458_v47 = vadd.f32 %v2091_v33, %v1963_v16  ;;  %v2272_v44 = vpop.f32.mrf.mxu1  ;;  %v3189_v16 = vld [vmem:[%s5748_s4 + $0x138] sm:$0xf0]  ;;  %v2491_v49 = vpop.permute.xlu1 %2490 }
 0x32e   :  { %v2273_v31 = vadd.f32 %v2272_v44, %v5181_v36 }
 0x330   :  { %2222 = vmatmul.bf16.gmra.mxu3 %v3300_v39  ;;  %2311 = vmatmul.bf16.gmra.mxu1 %v3176_v4  ;;  %3695 = vtanh.f32 %v2273_v31  ;;  %v5488_v4 = vpop.permute.xlu0 %1393 }
 0x331   :  { %5813 = vst [vmem:[#allocation7_spill] sm:$0xff] %v5488_v4  ;;  %v5814_v4 = vld [vmem:[#allocation20_spill] sm:$0xff] }
 0x333   :  { %v2183_v55 = vpop.f32.mrf.mxu3 }
 0x334   :  { %v2094_v3 = vpop.f32.mrf.mxu2  ;;  %v5468_v24 = vadd.f32 %v2183_v55, %v5183_v35  ;;  %v3487_v35 = vld [vmem:[%s5748_s4 + $0x12c] sm:$0xf]  ;;  %v3316_v55 = vor.u32 %v3521_v37, %v3315_v26 }
 0x335   :  { %v5471_v60 = vadd.f32 %v2094_v3, %v5811_v25  ;;  %v2274_v0 = vpop.f32.mrf.mxu1  ;;  %v3192_v3 = vor.u32 %v3487_v35, %v3189_v16 }
 0x336   :  { %v2275_v36 = vadd.f32 %v2274_v0, %v5210_v34  ;;  %v1968_v34 = vadd.f32 %v5812_v42, %v5377_v54  ;;  %v3696_v39 = vpop.eup %3695 }
 0x337   :  { %v2728_v17 = vmul.f32 %v3696_v39, %v2491_v49 }
 0x338   :  { %3697 = vtanh.f32 %v2275_v36 }
 0x33b   :  { %v2185_v33 = vpop.f32.mrf.mxu3 }
 0x33c   :  { %v2096_v44 = vpop.f32.mrf.mxu2  ;;  %v5491_v31 = vadd.f32 %v2185_v33, %v5212_v12  ;;  %v1971_v12 = vadd.f32 %v5814_v4, %v5374_v46  ;;  %v3525_v46 = vld [vmem:[%s5748_s4 + $0x254] sm:$0xf0] }
 0x33d   :  { %v5493_v25 = vadd.f32 %v2096_v44, %v1968_v34  ;;  %v2277_v0 = vpop.f32.mrf.mxu1  ;;  %v2501_v44 = vpop.permute.xlu0 %2500 }
 0x33e   :  { %v3698_v36 = vpop.eup %3697  ;;  %v2278_v56 = vadd.f32 %v2277_v0, %v5216_v40 }
 0x33f   :  { %v2729_v54 = vmul.f32 %v3698_v36, %v2496_v52 }
 0x340   :  { %3699 = vtanh.f32 %v2278_v56  ;;  %2227 = vmatmul.bf16.gmra.mxu3 %v3316_v55  ;;  %2316 = vmatmul.bf16.gmra.mxu1 %v3192_v3  ;;  %v3205_v56 = vld [vmem:[%s5748_s4 + $0x158] sm:$0xf0] }
 0x341   :  { %v2776_v42 = vadd.f32 %v2729_v54, %v2728_v17  ;;  %v3331_v17 = vld [vmem:[%s5748_s4 + $0x248] sm:$0xf]  ;;  %v2506_v54 = vpop.permute.xlu1 %2505 }
 0x342   :  { %v3332_v55 = vor.u32 %v3525_v46, %v3331_v17  ;;  %v2511_v46 = vpop.permute.xlu2 %2510 }
 0x343   :  { %v2188_v33 = vpop.f32.mrf.mxu3 }
 0x344   :  { %v2099_v26 = vpop.f32.mrf.mxu2  ;;  %v5499_v37 = vadd.f32 %v2188_v33, %v5218_v8  ;;  %v3491_v8 = vld [vmem:[%s5748_s4 + $0x14c] sm:$0xf] }
 0x345   :  { %v5501_v35 = vadd.f32 %v2099_v26, %v1971_v12  ;;  %v2279_v16 = vpop.f32.mrf.mxu1  ;;  %v3208_v3 = vor.u32 %v3491_v8, %v3205_v56  ;;  %v5815_v26 = vld [vmem:[#allocation23_spill] sm:$0xff] }
 0x346   :  { %v3700_v34 = vpop.eup %3699  ;;  %v2280_v49 = vadd.f32 %v2279_v16, %v5242_v20  ;;  %v1976_v16 = vadd.f32 %v5815_v26, %v5393_v61  ;;  %v3529_v61 = vld [vmem:[%s5748_s4 + $0x274] sm:$0xf0] }
 0x347   :  { %v2730_v52 = vmul.f32 %v3700_v34, %v2501_v44 }
 0x348   :  { %3701 = vtanh.f32 %v2280_v49 }
 0x349   :  { %v2777_v40 = vadd.f32 %v2776_v42, %v2730_v52 }
 0x34b   :  { %v2190_v20 = vpop.f32.mrf.mxu3 }
 0x34c   :  { %v5516_v39 = vpop.f32.mrf.mxu2  ;;  %v5519_v4 = vadd.f32 %v2190_v20, %v5244_v41  ;;  %v3221_v20 = vld [vmem:[%s5748_s4 + $0x178] sm:$0xf0] }
 0x34d   :  { %v2282_v0 = vpop.f32.mrf.mxu1 }
 0x34e   :  { %v3702_v36 = vpop.eup %3701  ;;  %v2283_v42 = vadd.f32 %v2282_v0, %v5249_v62 }
 0x34f   :  { %v2731_v12 = vmul.f32 %v3702_v36, %v2506_v54 }
 0x350   :  { %3703 = vtanh.f32 %v2283_v42  ;;  %2232 = vmatmul.bf16.gmra.mxu3 %v3332_v55  ;;  %2321 = vmatmul.bf16.gmra.mxu1 %v3208_v3  ;;  %v2516_v42 = vpop.permute.xlu0 %2515 }
 0x351   :  { %v2778_v33 = vadd.f32 %v2777_v40, %v2731_v12  ;;  %v3347_v40 = vld [vmem:[%s5748_s4 + $0x268] sm:$0xf] }
 0x352   :  { %v3348_v3 = vor.u32 %v3529_v61, %v3347_v40  ;;  %v3237_v40 = vld [vmem:[%s5748_s4 + $0x198] sm:$0xf0] }
 0x353   :  { %v2193_v34 = vpop.f32.mrf.mxu3 }
 0x354   :  { %v2104_v44 = vpop.f32.mrf.mxu2  ;;  %v5525_v41 = vadd.f32 %v2193_v34, %v5251_v23  ;;  %v3495_v23 = vld [vmem:[%s5748_s4 + $0x16c] sm:$0xf] }
 0x355   :  { %v5527_v49 = vadd.f32 %v2104_v44, %v1976_v16  ;;  %v2284_v52 = vpop.f32.mrf.mxu1  ;;  %v3224_v0 = vor.u32 %v3495_v23, %v3221_v20 }
 0x356   :  { %v3704_v17 = vpop.eup %3703  ;;  %v2285_v62 = vadd.f32 %v2284_v52, %v5275_v59 }
 0x357   :  { %v2732_v8 = vmul.f32 %v3704_v17, %v2511_v46 }
 0x358   :  { %3705 = vtanh.f32 %v2285_v62 }
 0x359   :  { %v2779_v56 = vadd.f32 %v2778_v33, %v2732_v8  ;;  %v3533_v8 = vld [vmem:[%s5748_s4 + $0x294] sm:$0xf0] }
 0x35b   :  { %v2195_v59 = vpop.f32.mrf.mxu3 }
 0x35c   :  { %v5543_v55 = vadd.f32 %v2195_v59, %v5277_v45  ;;  %v2521_v45 = vpop.permute.xlu1 %2520 }
 0x35d   :  { %v2287_v36 = vpop.f32.mrf.mxu1 }
 0x35e   :  { %v3706_v54 = vpop.eup %3705  ;;  %v2288_v12 = vadd.f32 %v2287_v36, %v5281_v18  ;;  %v3363_v18 = vld [vmem:[%s5748_s4 + $0x288] sm:$0xf] }
 0x35f   :  { %v2733_v33 = vmul.f32 %v3706_v54, %v2516_v42  ;;  %v3364_v61 = vor.u32 %v3533_v8, %v3363_v18 }
 0x360   :  { %3707 = vtanh.f32 %v2288_v12  ;;  %2237 = vmatmul.bf16.gmra.mxu3 %v3348_v3  ;;  %2326 = vmatmul.bf16.gmra.mxu1 %v3224_v0  ;;  %v2526_v3 = vpop.permute.xlu2 %2525 }
 0x361   :  { %v2780_v26 = vadd.f32 %v2779_v56, %v2733_v33 }
 0x363   :  { %v2198_v16 = vpop.f32.mrf.mxu3 }
 0x364   :  { %v5547_v34 = vadd.f32 %v2198_v16, %v5283_v48  ;;  %v3499_v48 = vld [vmem:[%s5748_s4 + $0x18c] sm:$0xf] }
 0x365   :  { %v2289_v44 = vpop.f32.mrf.mxu1  ;;  %v3240_v23 = vor.u32 %v3499_v48, %v3237_v40  ;;  %v2536_v40 = vpop.permute.xlu1 %2535 }
 0x366   :  { %v3708_v52 = vpop.eup %3707  ;;  %v2290_v17 = vadd.f32 %v2289_v44, %v5308_v14 }
 0x367   :  { %v2734_v46 = vmul.f32 %v3708_v52, %v2521_v45  ;;  %v3537_v45 = vld [vmem:[%s5748_s4 + $0x2b4] sm:$0xf0] }
 0x368   :  { %3709 = vtanh.f32 %v2290_v17  ;;  %v3253_v17 = vld [vmem:[%s5748_s4 + $0x1b8] sm:$0xf0] }
 0x369   :  { %v2781_v62 = vadd.f32 %v2780_v26, %v2734_v46 }
 0x36b   :  { %v2200_v14 = vpop.f32.mrf.mxu3 }
 0x36c   :  { %v5563_v56 = vadd.f32 %v2200_v14, %v5310_v30  ;;  %v2531_v30 = vpop.permute.xlu0 %2530 }
 0x36d   :  { %v2292_v20 = vpop.f32.mrf.mxu1 }
 0x36e   :  { %v3710_v59 = vpop.eup %3709  ;;  %v2293_v0 = vadd.f32 %v2292_v20, %v5314_v11  ;;  %v3379_v11 = vld [vmem:[%s5748_s4 + $0x2a8] sm:$0xf] }
 0x36f   :  { %v2735_v36 = vmul.f32 %v3710_v59, %v2526_v3  ;;  %v3380_v18 = vor.u32 %v3537_v45, %v3379_v11 }
 0x370   :  { %3711 = vtanh.f32 %v2293_v0  ;;  %2242 = vmatmul.bf16.gmra.mxu3 %v3364_v61  ;;  %2331 = vmatmul.bf16.gmra.mxu1 %v3240_v23 }
 0x371   :  { %v2782_v54 = vadd.f32 %v2781_v62, %v2735_v36 }
 0x373   :  { %v2203_v42 = vpop.f32.mrf.mxu3 }
 0x374   :  { %v5567_v12 = vadd.f32 %v2203_v42, %v5316_v19  ;;  %v3503_v19 = vld [vmem:[%s5748_s4 + $0x1ac] sm:$0xf]  ;;  %v2546_v45 = vpop.permute.xlu0 %2545 }
 0x375   :  { %v2294_v33 = vpop.f32.mrf.mxu1  ;;  %v3256_v62 = vor.u32 %v3503_v19, %v3253_v17 }
 0x376   :  { %v3712_v26 = vpop.eup %3711  ;;  %v2295_v16 = vadd.f32 %v2294_v33, %v5340_v13  ;;  %v3541_v33 = vld [vmem:[%s5748_s4 + $0x2d4] sm:$0xf0] }
 0x377   :  { %v2736_v44 = vmul.f32 %v3712_v26, %v2531_v30  ;;  %v3269_v26 = vld [vmem:[%s5748_s4 + $0x1d8] sm:$0xf0] }
 0x378   :  { %3713 = vtanh.f32 %v2295_v16 }
 0x379   :  { %v2783_v52 = vadd.f32 %v2782_v54, %v2736_v44 }
 0x37b   :  { %v2205_v13 = vpop.f32.mrf.mxu3 }
 0x37c   :  { %v5583_v46 = vadd.f32 %v2205_v13, %v5342_v2  ;;  %v2541_v2 = vpop.permute.xlu2 %2540 }
 0x37d   :  { %v2297_v8 = vpop.f32.mrf.mxu1 }
 0x37e   :  { %v3714_v48 = vpop.eup %3713  ;;  %v2298_v14 = vadd.f32 %v2297_v8, %v5349_v51  ;;  %v3395_v51 = vld [vmem:[%s5748_s4 + $0x2c8] sm:$0xf] }
 0x37f   :  { %v2737_v61 = vmul.f32 %v3714_v48, %v2536_v40  ;;  %v3396_v16 = vor.u32 %v3541_v33, %v3395_v51 }
 0x380   :  { %3715 = vtanh.f32 %v2298_v14  ;;  %2247 = vmatmul.bf16.gmra.mxu3 %v3380_v18  ;;  %2336 = vmatmul.bf16.gmra.mxu1 %v3256_v62 }
 0x381   :  { %v2784_v23 = vadd.f32 %v2783_v52, %v2737_v61 }
 0x383   :  { %v2208_v20 = vpop.f32.mrf.mxu3 }
 0x384   :  { %v5587_v59 = vadd.f32 %v2208_v20, %v5351_v29  ;;  %v3507_v29 = vld [vmem:[%s5748_s4 + $0x1cc] sm:$0xf]  ;;  %v3285_v20 = vld [vmem:[%s5748_s4 + $0x1f8] sm:$0xf0]  ;;  %v2556_v51 = vpop.permute.xlu2 %2555 }
 0x385   :  { %v2299_v3 = vpop.f32.mrf.mxu1  ;;  %v3272_v44 = vor.u32 %v3507_v29, %v3269_v26 }
 0x386   :  { %v3716_v0 = vpop.eup %3715  ;;  %v2300_v36 = vadd.f32 %v2299_v3, %v5379_v7 }
 0x387   :  { %v2738_v54 = vmul.f32 %v3716_v0, %v2541_v2 }
 0x388   :  { %3717 = vtanh.f32 %v2300_v36 }
 0x389   :  { %v2785_v42 = vadd.f32 %v2784_v23, %v2738_v54  ;;  %v3545_v23 = vld [vmem:[%s5748_s4 + $0x2f4] sm:$0xf0] }
 0x38b   :  { %v2210_v7 = vpop.f32.mrf.mxu3 }
 0x38c   :  { %v5603_v30 = vadd.f32 %v2210_v7, %v5381_v27  ;;  %v2551_v27 = vpop.permute.xlu1 %2550 }
 0x38d   :  { %v2302_v11 = vpop.f32.mrf.mxu1 }
 0x38e   :  { %v3718_v52 = vpop.eup %3717  ;;  %v2303_v19 = vadd.f32 %v2302_v11, %v5387_v1  ;;  %v3411_v1 = vld [vmem:[%s5748_s4 + $0x2e8] sm:$0xf] }
 0x38f   :  { %v2739_v17 = vmul.f32 %v3718_v52, %v2546_v45  ;;  %v3412_v0 = vor.u32 %v3545_v23, %v3411_v1 }
 0x390   :  { %3719 = vtanh.f32 %v2303_v19  ;;  %2252 = vmatmul.bf16.gmra.mxu3 %v3396_v16  ;;  %2341 = vmatmul.bf16.gmra.mxu1 %v3272_v44  ;;  %v3301_v19 = vld [vmem:[%s5748_s4 + $0x218] sm:$0xf0] }
 0x391   :  { %v2786_v13 = vadd.f32 %v2785_v42, %v2739_v17 }
 0x393   :  { %v2213_v18 = vpop.f32.mrf.mxu3 }
 0x394   :  { %v5607_v62 = vadd.f32 %v2213_v18, %v5391_v32  ;;  %v3511_v32 = vld [vmem:[%s5748_s4 + $0x1ec] sm:$0xf] }
 0x395   :  { %v2304_v8 = vpop.f32.mrf.mxu1  ;;  %v3288_v2 = vor.u32 %v3511_v32, %v3285_v20  ;;  %v2571_v32 = vpop.permute.xlu2 %2570 }
 0x396   :  { %v3720_v48 = vpop.eup %3719  ;;  %v2305_v40 = vadd.f32 %v2304_v8, %v5418_v6 }
 0x397   :  { %v2740_v14 = vmul.f32 %v3720_v48, %v2551_v27  ;;  %v2566_v48 = vpop.permute.xlu1 %2565 }
 0x398   :  { %3721 = vtanh.f32 %v2305_v40 }
 0x399   :  { %v2787_v61 = vadd.f32 %v2786_v13, %v2740_v14 }
 0x39b   :  { %v2215_v6 = vpop.f32.mrf.mxu3 }
 0x39c   :  { %v5623_v3 = vadd.f32 %v2215_v6, %v5420_v50  ;;  %v2561_v50 = vpop.permute.xlu0 %2560 }
 0x39d   :  { %v2307_v36 = vpop.f32.mrf.mxu1 }
 0x39e   :  { %v3722_v54 = vpop.eup %3721  ;;  %v2308_v42 = vadd.f32 %v2307_v36, %v5430_v22  ;;  %v3515_v22 = vld [vmem:[%s5748_s4 + $0x20c] sm:$0xf] }
 0x39f   :  { %v2741_v33 = vmul.f32 %v3722_v54, %v2556_v51  ;;  %v3304_v13 = vor.u32 %v3515_v22, %v3301_v19 }
 0x3a0   :  { %3723 = vtanh.f32 %v2308_v42  ;;  %2257 = vmatmul.bf16.gmra.mxu3 %v3412_v0  ;;  %2346 = vmatmul.bf16.gmra.mxu1 %v3288_v2  ;;  %v3317_v0 = vld [vmem:[%s5748_s4 + $0x238] sm:$0xf0] }
 0x3a1   :  { %v2788_v29 = vadd.f32 %v2787_v61, %v2741_v33 }
 0x3a3   :  { %v2218_v26 = vpop.f32.mrf.mxu3 }
 0x3a4   :  { %v5627_v7 = vadd.f32 %v2218_v26, %v5432_v9  ;;  %v2576_v42 = vpop.permute.xlu0 %2575 }
 0x3a5   :  { %v2309_v16 = vpop.f32.mrf.mxu1 }
 0x3a6   :  { %v3724_v44 = vpop.eup %3723  ;;  %v2310_v11 = vadd.f32 %v2309_v16, %v5456_v10 }
 0x3a7   :  { %v2742_v52 = vmul.f32 %v3724_v44, %v2561_v50 }
 0x3a8   :  { %3725 = vtanh.f32 %v2310_v11  ;;  %v2581_v11 = vpop.permute.xlu1 %2580 }
 0x3a9   :  { %v2789_v45 = vadd.f32 %v2788_v29, %v2742_v52 }
 0x3ab   :  { %v2220_v17 = vpop.f32.mrf.mxu3 }
 0x3ac   :  { %v5637_v9 = vadd.f32 %v2220_v17, %v5458_v47 }
 0x3ad   :  { %v2312_v18 = vpop.f32.mrf.mxu1 }
 0x3ae   :  { %v3726_v8 = vpop.eup %3725  ;;  %v2313_v10 = vadd.f32 %v2312_v18, %v5468_v24  ;;  %v3519_v24 = vld [vmem:[%s5748_s4 + $0x22c] sm:$0xf] }
 0x3af   :  { %v2743_v27 = vmul.f32 %v3726_v8, %v2566_v48  ;;  %v3320_v36 = vor.u32 %v3519_v24, %v3317_v0  ;;  %v3349_v24 = vld [vmem:[%s5748_s4 + $0x278] sm:$0xf0] }
 0x3b0   :  { %3727 = vtanh.f32 %v2313_v10  ;;  %2351 = vmatmul.bf16.gmra.mxu1 %v3304_v13  ;;  %v2586_v10 = vpop.permute.xlu2 %2585 }
 0x3b1   :  { %v2790_v40 = vadd.f32 %v2789_v45, %v2743_v27  ;;  %v5816_v45 = vld [vmem:[#allocation22_spill] sm:$0xff] }
 0x3b2   :  { %v1973_v22 = vadd.f32 %v5816_v45, %v5384_v53 }
 0x3b3   :  { %v2223_v14 = vpop.f32.mrf.mxu3 }
 0x3b4   :  { %v5641_v1 = vadd.f32 %v2223_v14, %v5471_v60  ;;  %v2102_v17 = vadd.f32 %v5516_v39, %v1973_v22  ;;  %v2591_v39 = vpop.permute.xlu0 %2590 }
 0x3b5   :  { %v2314_v61 = vpop.f32.mrf.mxu1 }
 0x3b6   :  { %v3728_v23 = vpop.eup %3727  ;;  %v2315_v47 = vadd.f32 %v2314_v61, %v5491_v31 }
 0x3b7   :  { %v2744_v20 = vmul.f32 %v3728_v23, %v2571_v32 }
 0x3b8   :  { %3729 = vtanh.f32 %v2315_v47 }
 0x3b9   :  { %v2791_v6 = vadd.f32 %v2790_v40, %v2744_v20 }
 0x3bb   :  { %v2225_v2 = vpop.f32.mrf.mxu3 }
 0x3bc   :  { %v5651_v60 = vadd.f32 %v2225_v2, %v5493_v25  ;;  %v2606_v45 = vpop.permute.xlu0 %2605 }
 0x3bd   :  { %v2317_v54 = vpop.f32.mrf.mxu1 }
 0x3be   :  { %v3730_v51 = vpop.eup %3729  ;;  %v2318_v31 = vadd.f32 %v2317_v54, %v5499_v37  ;;  %v3523_v37 = vld [vmem:[%s5748_s4 + $0x24c] sm:$0xf] }
 0x3bf   :  { %v2745_v33 = vmul.f32 %v3730_v51, %v2576_v42 }
 0x3c0   :  { %3731 = vtanh.f32 %v2318_v31  ;;  %2356 = vmatmul.bf16.gmra.mxu1 %v3320_v36  ;;  %v2596_v36 = vpop.permute.xlu1 %2595 }
 0x3c1   :  { %v2792_v29 = vadd.f32 %v2791_v6, %v2745_v33  ;;  %v2601_v33 = vpop.permute.xlu2 %2600 }
 0x3c3   :  { %v2228_v26 = vpop.f32.mrf.mxu3 }
 0x3c4   :  { %v5655_v16 = vadd.f32 %v2228_v26, %v5501_v35  ;;  %v3333_v35 = vld [vmem:[%s5748_s4 + $0x258] sm:$0xf0] }
 0x3c5   :  { %v2319_v44 = vpop.f32.mrf.mxu1 }
 0x3c6   :  { %v3732_v50 = vpop.eup %3731  ;;  %v2320_v25 = vadd.f32 %v2319_v44, %v5519_v4  ;;  %v3336_v4 = vor.u32 %v3523_v37, %v3333_v35 }
 0x3c7   :  { %v2746_v52 = vmul.f32 %v3732_v50, %v2581_v11  ;;  %v3531_v50 = vld [vmem:[%s5748_s4 + $0x28c] sm:$0xf] }
 0x3c8   :  { %3733 = vtanh.f32 %v2320_v25 }
 0x3c9   :  { %v2793_v19 = vadd.f32 %v2792_v29, %v2746_v52 }
 0x3cb   :  { %v2230_v13 = vpop.f32.mrf.mxu3 }
 0x3cc   :  { %v5667_v18 = vadd.f32 %v2230_v13, %v2102_v17  ;;  %v2611_v17 = vpop.permute.xlu1 %2610 }
 0x3cd   :  { %v2322_v8 = vpop.f32.mrf.mxu1 }
 0x3ce   :  { %v3734_v48 = vpop.eup %3733  ;;  %v2323_v53 = vadd.f32 %v2322_v8, %v5525_v41  ;;  %v3527_v41 = vld [vmem:[%s5748_s4 + $0x26c] sm:$0xf] }
 0x3cf   :  { %v2747_v27 = vmul.f32 %v3734_v48, %v2586_v10  ;;  %v3352_v0 = vor.u32 %v3527_v41, %v3349_v24  ;;  %v3535_v48 = vld [vmem:[%s5748_s4 + $0x2ac] sm:$0xf] }
 0x3d0   :  { %3735 = vtanh.f32 %v2323_v53  ;;  %2361 = vmatmul.bf16.gmra.mxu1 %v3336_v4  ;;  %v3539_v24 = vld [vmem:[%s5748_s4 + $0x2cc] sm:$0xf] }
 0x3d1   :  { %v2794_v40 = vadd.f32 %v2793_v19, %v2747_v27 }
 0x3d3   :  { %v2233_v14 = vpop.f32.mrf.mxu3 }
 0x3d4   :  { %v5671_v61 = vadd.f32 %v2233_v14, %v5527_v49 }
 0x3d5   :  { %v2324_v23 = vpop.f32.mrf.mxu1 }
 0x3d6   :  { %v3736_v32 = vpop.eup %3735  ;;  %v2325_v47 = vadd.f32 %v2324_v23, %v5543_v55 }
 0x3d7   :  { %v2748_v20 = vmul.f32 %v3736_v32, %v2591_v39 }
 0x3d8   :  { %3737 = vtanh.f32 %v2325_v47  ;;  %v2621_v47 = vpop.permute.xlu0 %2620 }
 0x3d9   :  { %v2795_v6 = vadd.f32 %v2794_v40, %v2748_v20  ;;  %v2616_v40 = vpop.permute.xlu2 %2615 }
 0x3dd   :  { %v2327_v2 = vpop.f32.mrf.mxu1 }
 0x3de   :  { %v3738_v49 = vpop.eup %3737  ;;  %v2328_v54 = vadd.f32 %v2327_v2, %v5547_v34  ;;  %v3365_v34 = vld [vmem:[%s5748_s4 + $0x298] sm:$0xf0] }
 0x3df   :  { %v2749_v51 = vmul.f32 %v3738_v49, %v2596_v36  ;;  %v3368_v11 = vor.u32 %v3531_v50, %v3365_v34  ;;  %v2626_v36 = vpop.permute.xlu1 %2625 }
 0x3e0   :  { %3739 = vtanh.f32 %v2328_v54  ;;  %2366 = vmatmul.bf16.gmra.mxu1 %v3352_v0 }
 0x3e1   :  { %v2796_v55 = vadd.f32 %v2795_v6, %v2749_v51 }
 0x3e5   :  { %v2329_v42 = vpop.f32.mrf.mxu1 }
 0x3e6   :  { %v3740_v31 = vpop.eup %3739  ;;  %v2330_v29 = vadd.f32 %v2329_v42, %v5563_v56 }
 0x3e7   :  { %v2750_v26 = vmul.f32 %v3740_v31, %v2601_v33  ;;  %v2631_v31 = vpop.permute.xlu2 %2630 }
 0x3e8   :  { %3741 = vtanh.f32 %v2330_v29 }
 0x3e9   :  { %v2797_v44 = vadd.f32 %v2796_v55, %v2750_v26 }
 0x3ed   :  { %v2332_v25 = vpop.f32.mrf.mxu1 }
 0x3ee   :  { %v3742_v52 = vpop.eup %3741  ;;  %v2333_v22 = vadd.f32 %v2332_v25, %v5567_v12  ;;  %v3381_v12 = vld [vmem:[%s5748_s4 + $0x2b8] sm:$0xf0]  ;;  %v2636_v25 = vpop.permute.xlu0 %2635 }
 0x3ef   :  { %v2751_v19 = vmul.f32 %v3742_v52, %v2606_v45  ;;  %v3384_v10 = vor.u32 %v3535_v48, %v3381_v12 }
 0x3f0   :  { %3743 = vtanh.f32 %v2333_v22  ;;  %2371 = vmatmul.bf16.gmra.mxu1 %v3368_v11 }
 0x3f1   :  { %v2798_v56 = vadd.f32 %v2797_v44, %v2751_v19  ;;  %v3543_v44 = vld [vmem:[%s5748_s4 + $0x2ec] sm:$0xf] }
 0x3f5   :  { %v2334_v37 = vpop.f32.mrf.mxu1 }
 0x3f6   :  { %v3744_v35 = vpop.eup %3743  ;;  %v2335_v13 = vadd.f32 %v2334_v37, %v5583_v46 }
 0x3f7   :  { %v2752_v4 = vmul.f32 %v3744_v35, %v2611_v17 }
 0x3f8   :  { %3745 = vtanh.f32 %v2335_v13 }
 0x3f9   :  { %v2799_v8 = vadd.f32 %v2798_v56, %v2752_v4  ;;  %v2641_v56 = vpop.permute.xlu1 %2640 }
 0x3fd   :  { %v2337_v53 = vpop.f32.mrf.mxu1 }
 0x3fe   :  { %v3746_v27 = vpop.eup %3745  ;;  %v2338_v14 = vadd.f32 %v2337_v53, %v5587_v59  ;;  %v3397_v59 = vld [vmem:[%s5748_s4 + $0x2d8] sm:$0xf0] }
 0x3ff   :  { %v2753_v23 = vmul.f32 %v3746_v27, %v2616_v40  ;;  %v3400_v0 = vor.u32 %v3539_v24, %v3397_v59  ;;  %v2651_v27 = vpop.permute.xlu0 %2650 }
 0x400   :  { %3747 = vtanh.f32 %v2338_v14  ;;  %2376 = vmatmul.bf16.gmra.mxu1 %v3384_v10 }
 0x401   :  { %v2800_v46 = vadd.f32 %v2799_v8, %v2753_v23  ;;  %v2646_v8 = vpop.permute.xlu2 %2645 }
 0x405   :  { %v2339_v32 = vpop.f32.mrf.mxu1 }
 0x406   :  { %v3748_v39 = vpop.eup %3747  ;;  %v2340_v20 = vadd.f32 %v2339_v32, %v5603_v30 }
 0x407   :  { %v2754_v6 = vmul.f32 %v3748_v39, %v2621_v47  ;;  %v2656_v47 = vpop.permute.xlu1 %2655 }
 0x408   :  { %3749 = vtanh.f32 %v2340_v20 }
 0x409   :  { %v2801_v41 = vadd.f32 %v2800_v46, %v2754_v6  ;;  %v2235_v46 = vpop.f32.mrf.mxu3 }
 0x40d   :  { %v2342_v2 = vpop.f32.mrf.mxu1 }
 0x40e   :  { %v3750_v49 = vpop.eup %3749  ;;  %v2343_v54 = vadd.f32 %v2342_v2, %v5607_v62  ;;  %v3413_v62 = vld [vmem:[%s5748_s4 + $0x2f8] sm:$0xf0]  ;;  %s3822_s4 = smov [#allocation3]  }
 0x40f   :  { %v2755_v51 = vmul.f32 %v3750_v49, %v2626_v36  ;;  %v3416_v50 = vor.u32 %v3543_v44, %v3413_v62  ;;  %s2862_s18 = sshll.u32 %s3822_s4, 4  ;;  %s2863_s18 = int_to_ptr.vmem [resolvable:$true] %s2862_s18 }
 0x410   :  { %3751 = vtanh.f32 %v2343_v54  ;;  %2381 = vmatmul.bf16.gmra.mxu1 %v3400_v0  ;;  %v2661_v0 = vpop.permute.xlu2 %2660 }
 0x411   :  { %v2802_v30 = vadd.f32 %v2801_v41, %v2755_v51 }
 0x415   :  { %v2344_v55 = vpop.f32.mrf.mxu1 }
 0x416   :  { %v3752_v42 = vpop.eup %3751  ;;  %v2345_v33 = vadd.f32 %v2344_v55, %v5623_v3 }
 0x417   :  { %v2756_v29 = vmul.f32 %v3752_v42, %v2631_v31  ;;  %v5817_v31 = vld [vmem:[#allocation24_spill] sm:$0xff] }
 0x418   :  { %3753 = vtanh.f32 %v2345_v33  ;;  %v1978_v33 = vadd.f32 %v5817_v31, %v5389_v38 }
 0x419   :  { %v2803_v26 = vadd.f32 %v2802_v30, %v2756_v29  ;;  %v2666_v30 = vpop.permute.xlu0 %2665 }
 0x41d   :  { %v2347_v34 = vpop.f32.mrf.mxu1 }
 0x41e   :  { %v3754_v11 = vpop.eup %3753  ;;  %v2348_v52 = vadd.f32 %v2347_v34, %v5627_v7  ;;  %v2671_v34 = vpop.permute.xlu1 %2670 }
 0x41f   :  { %v2757_v45 = vmul.f32 %v3754_v11, %v2636_v25 }
 0x420   :  { %3755 = vtanh.f32 %v2348_v52  ;;  %2386 = vmatmul.bf16.gmra.mxu1 %v3416_v50  ;;  %v5818_v52 = vld [vmem:[#allocation25_spill] sm:$0xff] }
 0x421   :  { %v2804_v3 = vadd.f32 %v2803_v26, %v2757_v45  ;;  %v1981_v45 = vadd.f32 %v5818_v52, %v5422_v21 }
 0x425   :  { %v2349_v22 = vpop.f32.mrf.mxu1 }
 0x426   :  { %v3756_v19 = vpop.eup %3755  ;;  %v2350_v37 = vadd.f32 %v2349_v22, %v5637_v9  ;;  %v2106_v9 = vpop.f32.mrf.mxu2 }
 0x427   :  { %v2758_v35 = vmul.f32 %v3756_v19, %v2641_v56  ;;  %v2107_v44 = vadd.f32 %v2106_v9, %v1978_v33  ;;  %v5820_v9 = vld [vmem:[#allocation28_spill] sm:$0xff] }
 0x428   :  { %3757 = vtanh.f32 %v2350_v37 }
 0x429   :  { %v2805_v17 = vadd.f32 %v2804_v3, %v2758_v35  ;;  %v2236_v62 = vadd.f32 %v2235_v46, %v2107_v44  ;;  %v1986_v46 = vadd.f32 %v5820_v9, %v5424_v57 }
 0x42d   :  { %v2352_v13 = vpop.f32.mrf.mxu1 }
 0x42e   :  { %v3758_v4 = vpop.eup %3757  ;;  %v2353_v48 = vadd.f32 %v2352_v13, %v5641_v1  ;;  %v2109_v41 = vpop.f32.mrf.mxu2 }
 0x42f   :  { %v2759_v12 = vmul.f32 %v3758_v4, %v2646_v8  ;;  %v2110_v22 = vadd.f32 %v2109_v41, %v1981_v45  ;;  %v2676_v4 = vpop.permute.xlu2 %2675 }
 0x430   :  { %3759 = vtanh.f32 %v2353_v48 }
 0x431   :  { %v2806_v7 = vadd.f32 %v2805_v17, %v2759_v12  ;;  %v5819_v17 = vld [vmem:[#allocation27_spill] sm:$0xff] }
 0x432   :  { %v1983_v13 = vadd.f32 %v5819_v17, %v5426_v58 }
 0x435   :  { %v2354_v10 = vpop.f32.mrf.mxu1 }
 0x436   :  { %v3760_v53 = vpop.eup %3759  ;;  %v2355_v40 = vadd.f32 %v2354_v10, %v5651_v60  ;;  %v2238_v60 = vpop.f32.mrf.mxu3 }
 0x437   :  { %v2760_v14 = vmul.f32 %v3760_v53, %v2651_v27  ;;  %v2111_v42 = vpop.f32.mrf.mxu2  ;;  %v2239_v56 = vadd.f32 %v2238_v60, %v2110_v22  ;;  %v2681_v27 = vpop.permute.xlu0 %2680 }
 0x438   :  { %3761 = vtanh.f32 %v2355_v40  ;;  %v2112_v8 = vadd.f32 %v2111_v42, %v1983_v13  ;;  %v2691_v57 = vpop.permute.xlu2 %2690 }
 0x439   :  { %v2807_v23 = vadd.f32 %v2806_v7, %v2760_v14 }
 0x43d   :  { %v2357_v32 = vpop.f32.mrf.mxu1 }
 0x43e   :  { %v3762_v39 = vpop.eup %3761  ;;  %v2358_v20 = vadd.f32 %v2357_v32, %v5655_v16  ;;  %v2240_v29 = vpop.f32.mrf.mxu3 }
 0x43f   :  { %v2761_v6 = vmul.f32 %v3762_v39, %v2656_v47  ;;  %v2114_v3 = vpop.f32.mrf.mxu2  ;;  %v2241_v7 = vadd.f32 %v2240_v29, %v2112_v8 }
 0x440   :  { %3763 = vtanh.f32 %v2358_v20  ;;  %v2115_v39 = vadd.f32 %v2114_v3, %v1986_v46 }
 0x441   :  { %v2808_v1 = vadd.f32 %v2807_v23, %v2761_v6 }
 0x445   :  { %v2359_v24 = vpop.f32.mrf.mxu1 }
 0x446   :  { %v3764_v59 = vpop.eup %3763  ;;  %v2360_v2 = vadd.f32 %v2359_v24, %v5667_v18  ;;  %v2243_v19 = vpop.f32.mrf.mxu3  ;;  %v5821_v24 = vld [vmem:[#allocation31_spill] sm:$0xff] }
 0x447   :  { %v2762_v49 = vmul.f32 %v3764_v59, %v2661_v0  ;;  %v2116_v48 = vpop.f32.mrf.mxu2  ;;  %v2244_v58 = vadd.f32 %v2243_v19, %v2115_v39  ;;  %v1988_v59 = vadd.f32 %v5821_v24, %v5434_v63  ;;  %v2686_v0 = vpop.permute.xlu1 %2685 }
 0x448   :  { %3765 = vtanh.f32 %v2360_v2 }
 0x449   :  { %v2809_v36 = vadd.f32 %v2808_v1, %v2762_v49  ;;  %v2117_v2 = vadd.f32 %v2116_v48, %v1988_v59 }
 0x44d   :  { %v2362_v54 = vpop.f32.mrf.mxu1 }
 0x44e   :  { %v3766_v51 = vpop.eup %3765  ;;  %v2363_v55 = vadd.f32 %v2362_v54, %v5671_v61  ;;  %v2245_v10 = vpop.f32.mrf.mxu3 }
 0x44f   :  { %v2763_v16 = vmul.f32 %v3766_v51, %v2666_v30  ;;  %v2119_v47 = vpop.f32.mrf.mxu2  ;;  %v2246_v49 = vadd.f32 %v2245_v10, %v2117_v2  ;;  %v2701_v22 = vpop.permute.xlu1 %2700  ;;  %v5825_v10 = vld [vmem:[#allocation35_spill] sm:$0xff] }
 0x450   :  { %3767 = vtanh.f32 %v2363_v55 }
 0x451   :  { %v2810_v26 = vadd.f32 %v2809_v36, %v2763_v16  ;;  %v5822_v16 = vld [vmem:[#allocation33_spill] sm:$0xff] }
 0x452   :  { %v1991_v31 = vadd.f32 %v5822_v16, %v5451_v43 }
 0x455   :  { %v2364_v18 = vpop.f32.mrf.mxu1 }
 0x456   :  { %v3768_v50 = vpop.eup %3767  ;;  %v2365_v11 = vadd.f32 %v2364_v18, %v2236_v62  ;;  %v2248_v1 = vpop.f32.mrf.mxu3 }
 0x457   :  { %v2764_v25 = vmul.f32 %v3768_v50, %v2671_v34  ;;  %v2121_v30 = vpop.f32.mrf.mxu2  ;;  %v1993_v50 = vadd.f32 %v5086_v28, %v5440_v15 }
 0x458   :  { %3769 = vtanh.f32 %v2365_v11  ;;  %v2696_v11 = vpop.permute.xlu0 %2695 }
 0x459   :  { %v2811_v61 = vadd.f32 %v2810_v26, %v2764_v25  ;;  %v2120_v26 = vadd.f32 %v2119_v47, %v1991_v31  ;;  %v2122_v25 = vadd.f32 %v2121_v30, %v1993_v50  ;;  %v2716_v30 = vpop.permute.xlu1 %2715 }
 0x45b   :  { %v2249_v63 = vadd.f32 %v2248_v1, %v2120_v26 }
 0x45d   :  { %v2367_v38 = vpop.f32.mrf.mxu1 }
 0x45e   :  { %v2368_v37 = vadd.f32 %v2367_v38, %v2239_v56  ;;  %v3770_v35 = vpop.eup %3769  ;;  %v2250_v33 = vpop.f32.mrf.mxu3 }
 0x45f   :  { %v2765_v12 = vmul.f32 %v3770_v35, %v2676_v4  ;;  %v2124_v34 = vpop.f32.mrf.mxu2  ;;  %v2251_v3 = vadd.f32 %v2250_v33, %v2122_v25 }
 0x460   :  { %3771 = vtanh.f32 %v2368_v37  ;;  %v5823_v37 = vld [vmem:[#allocation34_spill] sm:$0xff]  ;;  %v2711_v46 = vpop.permute.xlu0 %2710 }
 0x461   :  { %v2812_v14 = vadd.f32 %v2811_v61, %v2765_v12  ;;  %v1996_v35 = vadd.f32 %v5823_v37, %v5461_v5 }
 0x463   :  { %v2125_v13 = vadd.f32 %v2124_v34, %v1996_v35 }
 0x465   :  { %v2369_v21 = vpop.f32.mrf.mxu1 }
 0x466   :  { %v3772_v53 = vpop.eup %3771  ;;  %v2370_v40 = vadd.f32 %v2369_v21, %v2241_v7  ;;  %v2253_v52 = vpop.f32.mrf.mxu3  ;;  %v5824_v7 = vld [vmem:[#allocation29_spill] sm:$0xff] }
 0x467   :  { %v2766_v23 = vmul.f32 %v3772_v53, %v2681_v27  ;;  %v2126_v28 = vpop.f32.mrf.mxu2  ;;  %v2254_v15 = vadd.f32 %v2253_v52, %v2125_v13  ;;  %v1998_v21 = vadd.f32 %v5825_v10, %v5824_v7  ;;  %v2706_v53 = vpop.permute.xlu2 %2705 }
 0x468   :  { %3773 = vtanh.f32 %v2370_v40  ;;  %v2726_v50 = vpop.permute.xlu0 %2725 }
 0x469   :  { %v2813_v32 = vadd.f32 %v2812_v14, %v2766_v23  ;;  %v2127_v27 = vadd.f32 %v2126_v28, %v1998_v21 }
 0x46d   :  { %v2372_v20 = vpop.f32.mrf.mxu1 }
 0x46e   :  { %v2373_v6 = vadd.f32 %v2372_v20, %v2244_v58  ;;  %v3774_v41 = vpop.eup %3773  ;;  %v2255_v4 = vpop.f32.mrf.mxu3  ;;  %v5826_v20 = vld [vmem:[#allocation26_spill] sm:$0xff] }
 0x46f   :  { %v2767_v60 = vmul.f32 %v3774_v41, %v2686_v0  ;;  %v2256_v14 = vadd.f32 %v2255_v4, %v2127_v27  ;;  %v2129_v23 = vpop.f32.mrf.mxu2 }
 0x470   :  { %3775 = vtanh.f32 %v2373_v6  ;;  %v5827_v6 = vld [vmem:[#allocation36_spill] sm:$0xff] }
 0x471   :  { %v2814_v55 = vadd.f32 %v2813_v32, %v2767_v60  ;;  %v2001_v1 = vadd.f32 %v5827_v6, %v5826_v20 }
 0x473   :  { %v2130_v24 = vadd.f32 %v2129_v23, %v2001_v1 }
 0x475   :  { %v2374_v36 = vpop.f32.mrf.mxu1 }
 0x476   :  { %v3776_v54 = vpop.eup %3775  ;;  %v2375_v51 = vadd.f32 %v2374_v36, %v2246_v49  ;;  %v2258_v39 = vpop.f32.mrf.mxu3  ;;  %v5828_v36 = vld [vmem:[#allocation7_spill] sm:$0xff] }
 0x477   :  { %v2768_v42 = vmul.f32 %v3776_v54, %v2691_v57  ;;  %v2259_v59 = vadd.f32 %v2258_v39, %v2130_v24  ;;  %v2131_v60 = vpop.f32.mrf.mxu2  ;;  %v5829_v54 = vld [vmem:[#allocation37_spill] sm:$0xff] }
 0x478   :  { %3777 = vtanh.f32 %v2375_v51  ;;  %v2003_v57 = vadd.f32 %v5829_v54, %v5828_v36 }
 0x479   :  { %v2815_v29 = vadd.f32 %v2814_v55, %v2768_v42 }
 0x47a   :  { %v2132_v55 = vadd.f32 %v2131_v60, %v2003_v57 }
 0x47d   :  { %v2377_v44 = vpop.f32.mrf.mxu1 }
 0x47e   :  { %v2378_v62 = vadd.f32 %v2377_v44, %v2249_v63  ;;  %v3778_v18 = vpop.eup %3777  ;;  %v2260_v51 = vpop.f32.mrf.mxu3 }
 0x47f   :  { %v2769_v45 = vmul.f32 %v3778_v18, %v2696_v11  ;;  %v2261_v16 = vadd.f32 %v2260_v51, %v2132_v55 }
 0x480   :  { %3779 = vtanh.f32 %v2378_v62 }
 0x481   :  { %v2816_v56 = vadd.f32 %v2815_v29, %v2769_v45  ;;  %v2721_v29 = vpop.permute.xlu2 %2720 }
 0x485   :  { %v2379_v61 = vpop.f32.mrf.mxu1 }
 0x486   :  { %v3780_v43 = vpop.eup %3779  ;;  %v2380_v19 = vadd.f32 %v2379_v61, %v2251_v3  ;;  %v2833_v61 = vpop.permute.xlu1 %2832 }
 0x487   :  { %v2770_v38 = vmul.f32 %v3780_v43, %v2701_v22  ;;  %v2835_v22 = vperm.slane %v2833_v61, 0 }
 0x488   :  { %3781 = vtanh.f32 %v2380_v19 }
 0x489   :  { %v2817_v17 = vadd.f32 %v2816_v56, %v2770_v38 }
 0x48d   :  { %v2382_v8 = vpop.f32.mrf.mxu1 }
 0x48e   :  { %v2383_v48 = vadd.f32 %v2382_v8, %v2254_v15  ;;  %v3782_v12 = vpop.eup %3781 }
 0x48f   :  { %v2771_v40 = vmul.f32 %v3782_v12, %v2706_v53 }
 0x490   :  { %3783 = vtanh.f32 %v2383_v48 }
 0x491   :  { %v2818_v58 = vadd.f32 %v2817_v17, %v2771_v40 }
 0x495   :  { %v2384_v9 = vpop.f32.mrf.mxu1 }
 0x496   :  { %v3784_v5 = vpop.eup %3783  ;;  %v2385_v32 = vadd.f32 %v2384_v9, %v2256_v14 }
 0x497   :  { %v2772_v47 = vmul.f32 %v3784_v5, %v2711_v46 }
 0x498   :  { %3785 = vtanh.f32 %v2385_v32 }
 0x499   :  { %v2819_v41 = vadd.f32 %v2818_v58, %v2772_v47 }
 0x49d   :  { %v2387_v0 = vpop.f32.mrf.mxu1 }
 0x49e   :  { %v2388_v2 = vadd.f32 %v2387_v0, %v2259_v59  ;;  %v3786_v49 = vpop.eup %3785 }
 0x49f   :  { %v2773_v42 = vmul.f32 %v3786_v49, %v2716_v30 }
 0x4a0   :  { %3787 = vtanh.f32 %v2388_v2 }
 0x4a1   :  { %v2820_v63 = vadd.f32 %v2819_v41, %v2773_v42 }
 0x4a5   :  { %v2389_v31 = vpop.f32.mrf.mxu1 }
 0x4a6   :  { %v3788_v33 = vpop.eup %3787  ;;  %v2390_v26 = vadd.f32 %v2389_v31, %v2261_v16 }
 0x4a7   :  { %v2774_v44 = vmul.f32 %v3788_v33, %v2721_v29 }
 0x4a8   :  { %3789 = vtanh.f32 %v2390_v26 }
 0x4a9   :  { %v2821_v62 = vadd.f32 %v2820_v63, %v2774_v44 }
 0x4ae   :  { %v3790_v18 = vpop.eup %3789 }
 0x4af   :  { %v2775_v34 = vmul.f32 %v3790_v18, %v2726_v50 }
 0x4b1   :  { %v2822_v11 = vadd.f32 %v2821_v62, %v2775_v34 }
 0x4b3   :  { %v2823_v25 = vrot.slane %v2822_v11, 4 }
 0x4b5   :  { %v2824_v52 = vadd.f32 %v2823_v25, %v2822_v11 }
 0x4b7   :  { %v2825_v45 = vrot.slane %v2824_v52, 2 }
 0x4b9   :  { %v2826_v3 = vadd.f32 %v2825_v45, %v2824_v52 }
 0x4bb   :  { %v2827_v43 = vrot.slane %v2826_v3, 1 }
 0x4bd   :  { %v2828_v19 = vadd.f32 %v2827_v43, %v2826_v3 }
 0x4bf   :  { %v2836_v56 = vadd.f32 %v2835_v22, %v2828_v19 }
 0x4c1   :  { %v3417_v38 = vmul.f32 -1.442695, %v2836_v56 }
 0x4c3   :  { %3791 = vpow2.f32 %v3417_v38 }
 0x4c9   :  { %v3792_v37 = vpop.eup %3791 }
 0x4ca   :  { %v2840_v35 = vadd.f32 1.0, %v3792_v37 }
 0x4cc   :  { %3793 = vrcp.f32 %v2840_v35  ;;  %v2852_v15 = vand.u32 2147483648, %v2840_v35  ;;  %v2850_v8 = vand.u32 2147483647, %v2840_v35  ;;  %vm2846_vm3 = vweird.f32 %v2840_v35 }
 0x4ce   :  { %v2853_v12 = vor.u32 1.1754944e-38, %v2852_v15  ;;  %vm2851_vm5 = vcmp.eq.f32.partialorder %v2850_v8, 8.507059e+37 }
 0x4d2   :  { %v3794_v17 = vpop.eup %3793 }
 0x4d3   :  { %v2842_v13 = vmul.f32 %v3794_v17, %v2840_v35  ;;  %vm2847_vm2 = vweird.f32 %v3794_v17 }
 0x4d4   :  { %vm2848_vm4 = vmor %vm2846_vm3, %vm2847_vm2 }
 0x4d5   :  { %v2843_v28 = vsub.f32 1.0, %v2842_v13 }
 0x4d7   :  { %v2844_v4 = vmul.f32 %v3794_v17, %v2843_v28 }
 0x4d9   :  { %v2845_v48 = vadd.f32 %v3794_v17, %v2844_v4 }
 0x4db   :  { %v2849_v7 = vsel %vm2848_vm4, %v3794_v17, %v2845_v48 }
 0x4dc   :  { %v2854_v10 = vsel %vm2851_vm5, %v2853_v12, %v2849_v7 }
 0x4dd   :  { %2856 = vst [vmem:[#allocation3] sm:$0x1] %v2854_v10 }
 0x4de   :  { %2867 = dma.vmem_to_hbm [thread:$0]  %s2863_s18, 16, %s2865_s20, [#allocation4]  }
 0x4df   :  { %3819 = dma.done.wait [#allocation4], 16  }
 0x4e0   :  { %3820 = vsyncadd [#allocation4], 4294967280 }
 0x4e1   :  { %2872 = vsyncpa [#allocation4], 1 }

</bundles_post_ra>
